<compile_context>
chip_gen: v7x
topology: tpu7x:2x2x1
jax: 0.10.0
libtpu: 0.0.40
codegen_flags: <defaults>
</compile_context>

<pallas_src>
import functools

import jax
import jax.numpy as jnp
from jax.experimental import pallas as pl
from jax.experimental.pallas import tpu as pltpu


def _round_up(x, m):
    return ((x + m - 1) // m) * m


def _vmem_budget_bytes():
    """~75% of this generation's VMEM: 96 MiB on v5e/v6e, 48 MiB on v7x."""
    try:
        cap = int(pltpu.get_tpu_info().vmem_capacity_bytes)
    except Exception:
        cap = 64 * 1024 * 1024  # conservative (v7x-sized) fallback
    return (cap * 3) // 4


def _pick_tile_b(batch, dims_pad, resident_bytes, vmem_limit):
    """Pick a 128-multiple batch tile that fits VMEM and keeps >=2 grid steps."""
    d0 = dims_pad[0]
    max_d = max(dims_pad)
    # Per-row VMEM estimate: bf16 input tile (x2 pipeline buffers) + f32 output
    # tile (x2) + f32/bf16 working activations inside the kernel.
    per_row = 2 * 2 * d0 + 2 * 4 * d0 + 8 * max_d
    # Be conservative: assume weights could end up double-buffered (fallback).
    avail = vmem_limit - 2 * resident_bytes - (8 << 20)
    cap = max(128, (avail // max(per_row, 1)) // 128 * 128)
    tile_b = min(1024, cap, _round_up(batch, 128))
    # Ensure the "parallel" batch axis has >=2 steps (feeds both TCs on v7x).
    while tile_b > 128 and _round_up(batch, tile_b) // tile_b < 2:
        tile_b = max(128, ((tile_b // 2) // 128) * 128)
    return tile_b


def _sigmoid_f32(z):
    # exp goes to the EUP; the divide uses the EUP approx reciprocal (its own
    # VLIW slot), keeping the VPU free.  Saturates correctly at 0 and 1.
    return pl.reciprocal(1.0 + jnp.exp(-z), approx=True)


def _make_dbn_kernel(num_layers):
    """Kernel closure over the (static) number of RBM layers."""

    def kernel(*refs):
        # refs = [x, (W, W^T, h_bias, v_bias) * num_layers, out]
        x_ref = refs[0]
        out_ref = refs[-1]
        params = refs[1:-1]

        act = x_ref[...]                               # (tile_b, d0_pad) bf16

        # ---- bottom-up pass: sample_h_given_v probabilities ----
        for i in range(num_layers):
            w = params[4 * i][...]                     # (din_p, dout_p) bf16, resident
            hb = params[4 * i + 2][...]                # (1, dout_p) f32
            z = jnp.dot(act, w, preferred_element_type=jnp.float32)
            act = _sigmoid_f32(z + hb).astype(jnp.bfloat16)

        # ---- top-down pass: sample_v_given_h probabilities ----
        for i in range(num_layers - 1, -1, -1):
            wt = params[4 * i + 1][...]                # (dout_p, din_p) bf16, resident
            vb = params[4 * i + 3][...]                # (1, din_p) f32
            z = jnp.dot(act, wt, preferred_element_type=jnp.float32)
            p = _sigmoid_f32(z + vb)                   # f32
            act = p.astype(jnp.bfloat16) if i > 0 else p

        out_ref[...] = act.astype(out_ref.dtype)

    return kernel


def prepare_dbn_params(weights, h_biases, v_biases):
    """Pad (zero) + cast + transpose all parameters ONCE, outside the call path.

    weights : list of (d_in_i, d_out_i) float32
    h_biases: list of (1, d_out_i) float32
    v_biases: list of (1, d_in_i)  float32
    """
    num_layers = len(weights)
    assert len(h_biases) == num_layers and len(v_biases) == num_layers

    dims = [weights[0].shape[0]] + [w.shape[1] for w in weights]
    dims_pad = [_round_up(d, 128) for d in dims]       # lane-dense features

    flat = []
    for i, (w, hb, vb) in enumerate(zip(weights, h_biases, v_biases)):
        din_p, dout_p = dims_pad[i], dims_pad[i + 1]
        # Padded regions MUST stay zero (see invariant at top of file).
        w_p = jnp.zeros((din_p, dout_p), jnp.bfloat16)
        w_p = w_p.at[: w.shape[0], : w.shape[1]].set(
            jnp.asarray(w, jnp.float32).astype(jnp.bfloat16))
        wt_p = jnp.transpose(w_p)                      # one-time transpose
        hb_p = jnp.zeros((1, dout_p), jnp.float32)
        hb_p = hb_p.at[:, : hb.shape[1]].set(jnp.asarray(hb, jnp.float32))
        vb_p = jnp.zeros((1, din_p), jnp.float32)
        vb_p = vb_p.at[:, : vb.shape[1]].set(jnp.asarray(vb, jnp.float32))
        flat += [w_p, wt_p, hb_p, vb_p]

    flat = tuple(jax.block_until_ready(a) for a in flat)
    return {
        "flat_params": flat,
        "dims": tuple(dims),
        "dims_pad": tuple(dims_pad),
        "num_layers": num_layers,
    }


@functools.partial(
    jax.jit,
    static_argnames=("num_layers", "tile_b", "d0_pad", "vmem_limit_bytes",
                     "single_buffer_consts", "out_dtype"),
)
def _dbn_forward_jit(visible, flat_params, *, num_layers, tile_b, d0_pad,
                     vmem_limit_bytes, single_buffer_consts, out_dtype):
    B, d_vis = visible.shape
    b_pad = _round_up(B, tile_b)

    x = visible.astype(jnp.bfloat16)                   # stream activations in bf16
    if (b_pad, d0_pad) != (B, d_vis):
        x = jnp.pad(x, ((0, b_pad - B), (0, d0_pad - d_vis)))

    act_map = lambda b: (b, 0)
    const_map = lambda b: (0, 0)
    # Constant-index blocks never change across grid steps -> single buffer.
    const_kwargs = (
        {"pipeline_mode": pl.Buffered(1)} if single_buffer_consts else {}
    )

    in_specs = [pl.BlockSpec((tile_b, d0_pad), act_map)]
    for i in range(num_layers):
        w, wt, hb, vb = flat_params[4 * i: 4 * i + 4]
        in_specs += [
            pl.BlockSpec(w.shape, const_map, **const_kwargs),
            pl.BlockSpec(wt.shape, const_map, **const_kwargs),
            pl.BlockSpec(hb.shape, const_map, **const_kwargs),
            pl.BlockSpec(vb.shape, const_map, **const_kwargs),
        ]

    out = pl.pallas_call(
        _make_dbn_kernel(num_layers),
        out_shape=jax.ShapeDtypeStruct((b_pad, d0_pad), out_dtype),
        grid=(b_pad // tile_b,),
        in_specs=in_specs,
        out_specs=pl.BlockSpec((tile_b, d0_pad), act_map),
        compiler_params=pltpu.CompilerParams(
            dimension_semantics=("parallel",),          # megacore on v7x
            vmem_limit_bytes=int(vmem_limit_bytes),     # generation-aware budget
        ),
    )(x, *flat_params)

    return out[:B, :d_vis]


def dbn_forward(visible, params, *, tile_b=None, out_dtype=jnp.float32):
    """Full DBN reconstruction. `params` comes from prepare_dbn_params()."""
    flat_params = params["flat_params"]
    dims = params["dims"]
    dims_pad = params["dims_pad"]
    num_layers = params["num_layers"]

    B, d_vis = visible.shape
    assert d_vis == dims[0], "visible width does not match the first RBM layer"

    vmem_limit = _vmem_budget_bytes()
    resident = sum(int(a.size) * a.dtype.itemsize for a in flat_params)
    if tile_b is None:
        tile_b = _pick_tile_b(B, dims_pad, resident, vmem_limit)
    tile_b = max(128, (int(tile_b) // 128) * 128)
    tile_b = min(tile_b, _round_up(B, 128))            # avoid gross batch padding

    common = dict(num_layers=num_layers, tile_b=tile_b, d0_pad=dims_pad[0],
                  vmem_limit_bytes=vmem_limit, out_dtype=out_dtype)
    try:
        out = _dbn_forward_jit(visible, flat_params,
                               single_buffer_consts=True, **common)
        return jax.block_until_ready(out)
    except Exception:
        # Fallback: runtime rejected single-buffered constant blocks; use the
        # default double-buffering (correctness identical, more VMEM).
        out = _dbn_forward_jit(visible, flat_params,
                               single_buffer_consts=False, **common)
        return jax.block_until_ready(out)


def _reference_forward(visible, weights, h_biases, v_biases):
    """Pure-JAX f32 reference for correctness checking."""
    act = visible.astype(jnp.float32)
    for w, hb in zip(weights, h_biases):
        act = jax.nn.sigmoid(act @ w + hb)
    for w, vb in zip(reversed(weights), reversed(v_biases)):
        act = jax.nn.sigmoid(act @ w.T + vb)
    return act


if __name__ == "__main__":
    # Small, DBN-consistent shapes: a batch of flattened "images".
    batch = 256
    visible_dim = 64
    hidden_dims = [32, 16]

    key = jax.random.PRNGKey(0)
    keys = jax.random.split(key, 2 * len(hidden_dims) + 1)

    dims = [visible_dim] + hidden_dims
    weights, h_biases, v_biases = [], [], []
    for i in range(len(hidden_dims)):
        d_in, d_out = dims[i], dims[i + 1]
        weights.append(
            0.1 * jax.random.normal(keys[2 * i], (d_in, d_out), dtype=jnp.float32))
        h_biases.append(
            0.05 * jax.random.normal(keys[2 * i + 1], (1, d_out), dtype=jnp.float32))
        v_biases.append(jnp.zeros((1, d_in), dtype=jnp.float32))

    visible = jax.random.uniform(keys[-1], (batch, visible_dim), dtype=jnp.float32)

    params = prepare_dbn_params(weights, h_biases, v_biases)
    out = dbn_forward(visible, params)
    out = jax.block_until_ready(out)

    ref = _reference_forward(visible, weights, h_biases, v_biases)
    assert out.shape == (batch, visible_dim)
    # bf16 weights + bf16 inter-layer activations + EUP approx reciprocal give a
    # few e-3 drift vs the pure f32 reference (values live in [0, 1]).
    assert jnp.allclose(out, ref, atol=3e-2, rtol=0.0), "mismatch vs JAX reference"

    print("KERNEL_OK")
</pallas_src>

<mosaic_0001>
module attributes {stable_mosaic.version = 11 : i64} {
  func.func @kernel(%arg0: i32, %arg1: memref<128x128xbf16, #tpu.memory_space<vmem>>, %arg2: memref<128x128xbf16, #tpu.memory_space<vmem>>, %arg3: memref<128x128xbf16, #tpu.memory_space<vmem>>, %arg4: memref<1x128xf32, #tpu.memory_space<vmem>>, %arg5: memref<1x128xf32, #tpu.memory_space<vmem>>, %arg6: memref<128x128xbf16, #tpu.memory_space<vmem>>, %arg7: memref<128x128xbf16, #tpu.memory_space<vmem>>, %arg8: memref<1x128xf32, #tpu.memory_space<vmem>>, %arg9: memref<1x128xf32, #tpu.memory_space<vmem>>, %arg10: memref<128x128xf32, #tpu.memory_space<vmem>>) attributes {dimension_semantics = [#tpu.dimension_semantics<parallel>], iteration_bounds = array<i64: 2>, scalar_prefetch = 0 : i64, scratch_operands = 0 : i64, tpu.core_type = #tpu.core_type<tc>, window_params = [{transform_indices = @transform_0, window_bounds = array<i64: 128, 128>}, {pipeline_mode = #tpu.pipeline_mode<synchronous>, transform_indices = @transform_1, window_bounds = array<i64: 128, 128>}, {pipeline_mode = #tpu.pipeline_mode<synchronous>, transform_indices = @transform_2, window_bounds = array<i64: 128, 128>}, {pipeline_mode = #tpu.pipeline_mode<synchronous>, transform_indices = @transform_3, window_bounds = array<i64: 1, 128>}, {pipeline_mode = #tpu.pipeline_mode<synchronous>, transform_indices = @transform_4, window_bounds = array<i64: 1, 128>}, {pipeline_mode = #tpu.pipeline_mode<synchronous>, transform_indices = @transform_5, window_bounds = array<i64: 128, 128>}, {pipeline_mode = #tpu.pipeline_mode<synchronous>, transform_indices = @transform_6, window_bounds = array<i64: 128, 128>}, {pipeline_mode = #tpu.pipeline_mode<synchronous>, transform_indices = @transform_7, window_bounds = array<i64: 1, 128>}, {pipeline_mode = #tpu.pipeline_mode<synchronous>, transform_indices = @transform_8, window_bounds = array<i64: 1, 128>}, {transform_indices = @transform_9, window_bounds = array<i64: 128, 128>}]} {
    %c0 = arith.constant 0 : index
    %c0_0 = arith.constant 0 : index
    %0 = vector.load %arg1[%c0, %c0_0] : memref<128x128xbf16, #tpu.memory_space<vmem>>, vector<128x128xbf16>
    %c0_1 = arith.constant 0 : index
    %c0_2 = arith.constant 0 : index
    %1 = vector.load %arg2[%c0_1, %c0_2] : memref<128x128xbf16, #tpu.memory_space<vmem>>, vector<128x128xbf16>
    %c0_3 = arith.constant 0 : index
    %c0_4 = arith.constant 0 : index
    %2 = vector.load %arg4[%c0_3, %c0_4] : memref<1x128xf32, #tpu.memory_space<vmem>>, vector<1x128xf32>
    %cst = arith.constant dense<0.000000e+00> : vector<128x128xf32>
    %3 = tpu.matmul %0, %1, %cst {dimension_numbers = #tpu.dot_dimension_numbers<[1], [0], [0], [1], [0, 0, 1, 1], [], []>} : vector<128x128xbf16>, vector<128x128xbf16>, vector<128x128xf32> -> vector<128x128xf32>
    %4 = vector.broadcast %2 : vector<1x128xf32> to vector<128x128xf32>
    %5 = arith.addf %3, %4 : vector<128x128xf32>
    %cst_5 = arith.constant 0.000000e+00 : f32
    %6 = vector.broadcast %cst_5 : f32 to vector<128x128xf32>
    %7 = arith.subf %6, %5 : vector<128x128xf32>
    %8 = math.exp %7 : vector<128x128xf32>
    %cst_6 = arith.constant 1.000000e+00 : f32
    %9 = vector.broadcast %cst_6 : f32 to vector<128x128xf32>
    %10 = arith.addf %9, %8 : vector<128x128xf32>
    %11 = tpu.reciprocal %10 {approx = true} : vector<128x128xf32> -> vector<128x128xf32>
    %12 = arith.truncf %11 : vector<128x128xf32> to vector<128x128xbf16>
    %c0_7 = arith.constant 0 : index
    %c0_8 = arith.constant 0 : index
    %13 = vector.load %arg6[%c0_7, %c0_8] : memref<128x128xbf16, #tpu.memory_space<vmem>>, vector<128x128xbf16>
    %c0_9 = arith.constant 0 : index
    %c0_10 = arith.constant 0 : index
    %14 = vector.load %arg8[%c0_9, %c0_10] : memref<1x128xf32, #tpu.memory_space<vmem>>, vector<1x128xf32>
    %cst_11 = arith.constant dense<0.000000e+00> : vector<128x128xf32>
    %15 = tpu.matmul %12, %13, %cst_11 {dimension_numbers = #tpu.dot_dimension_numbers<[1], [0], [0], [1], [0, 0, 1, 1], [], []>} : vector<128x128xbf16>, vector<128x128xbf16>, vector<128x128xf32> -> vector<128x128xf32>
    %16 = vector.broadcast %14 : vector<1x128xf32> to vector<128x128xf32>
    %17 = arith.addf %15, %16 : vector<128x128xf32>
    %cst_12 = arith.constant 0.000000e+00 : f32
    %18 = vector.broadcast %cst_12 : f32 to vector<128x128xf32>
    %19 = arith.subf %18, %17 : vector<128x128xf32>
    %20 = math.exp %19 : vector<128x128xf32>
    %cst_13 = arith.constant 1.000000e+00 : f32
    %21 = vector.broadcast %cst_13 : f32 to vector<128x128xf32>
    %22 = arith.addf %21, %20 : vector<128x128xf32>
    %23 = tpu.reciprocal %22 {approx = true} : vector<128x128xf32> -> vector<128x128xf32>
    %24 = arith.truncf %23 : vector<128x128xf32> to vector<128x128xbf16>
    %c0_14 = arith.constant 0 : index
    %c0_15 = arith.constant 0 : index
    %25 = vector.load %arg7[%c0_14, %c0_15] : memref<128x128xbf16, #tpu.memory_space<vmem>>, vector<128x128xbf16>
    %c0_16 = arith.constant 0 : index
    %c0_17 = arith.constant 0 : index
    %26 = vector.load %arg9[%c0_16, %c0_17] : memref<1x128xf32, #tpu.memory_space<vmem>>, vector<1x128xf32>
    %cst_18 = arith.constant dense<0.000000e+00> : vector<128x128xf32>
    %27 = tpu.matmul %24, %25, %cst_18 {dimension_numbers = #tpu.dot_dimension_numbers<[1], [0], [0], [1], [0, 0, 1, 1], [], []>} : vector<128x128xbf16>, vector<128x128xbf16>, vector<128x128xf32> -> vector<128x128xf32>
    %28 = vector.broadcast %26 : vector<1x128xf32> to vector<128x128xf32>
    %29 = arith.addf %27, %28 : vector<128x128xf32>
    %cst_19 = arith.constant 0.000000e+00 : f32
    %30 = vector.broadcast %cst_19 : f32 to vector<128x128xf32>
    %31 = arith.subf %30, %29 : vector<128x128xf32>
    %32 = math.exp %31 : vector<128x128xf32>
    %cst_20 = arith.constant 1.000000e+00 : f32
    %33 = vector.broadcast %cst_20 : f32 to vector<128x128xf32>
    %34 = arith.addf %33, %32 : vector<128x128xf32>
    %35 = tpu.reciprocal %34 {approx = true} : vector<128x128xf32> -> vector<128x128xf32>
    %36 = arith.truncf %35 : vector<128x128xf32> to vector<128x128xbf16>
    %c0_21 = arith.constant 0 : index
    %c0_22 = arith.constant 0 : index
    %37 = vector.load %arg3[%c0_21, %c0_22] : memref<128x128xbf16, #tpu.memory_space<vmem>>, vector<128x128xbf16>
    %c0_23 = arith.constant 0 : index
    %c0_24 = arith.constant 0 : index
    %38 = vector.load %arg5[%c0_23, %c0_24] : memref<1x128xf32, #tpu.memory_space<vmem>>, vector<1x128xf32>
    %cst_25 = arith.constant dense<0.000000e+00> : vector<128x128xf32>
    %39 = tpu.matmul %36, %37, %cst_25 {dimension_numbers = #tpu.dot_dimension_numbers<[1], [0], [0], [1], [0, 0, 1, 1], [], []>} : vector<128x128xbf16>, vector<128x128xbf16>, vector<128x128xf32> -> vector<128x128xf32>
    %40 = vector.broadcast %38 : vector<1x128xf32> to vector<128x128xf32>
    %41 = arith.addf %39, %40 : vector<128x128xf32>
    %cst_26 = arith.constant 0.000000e+00 : f32
    %42 = vector.broadcast %cst_26 : f32 to vector<128x128xf32>
    %43 = arith.subf %42, %41 : vector<128x128xf32>
    %44 = math.exp %43 : vector<128x128xf32>
    %cst_27 = arith.constant 1.000000e+00 : f32
    %45 = vector.broadcast %cst_27 : f32 to vector<128x128xf32>
    %46 = arith.addf %45, %44 : vector<128x128xf32>
    %47 = tpu.reciprocal %46 {approx = true} : vector<128x128xf32> -> vector<128x128xf32>
    %c0_28 = arith.constant 0 : index
    %c0_29 = arith.constant 0 : index
    %48 = vector.load %arg10[%c0_28, %c0_29] : memref<128x128xf32, #tpu.memory_space<vmem>>, vector<128x128xf32>
    tpu.vector_store %arg10[%c0_28, %c0_29], %47 {strides = array<i32>} : memref<128x128xf32, #tpu.memory_space<vmem>>, vector<128x128xf32>,
    return
  }
  func.func @transform_0(%arg0: i32) -> (i32, i32) {
    %c0_i32 = arith.constant 0 : i32
    %c0_i32_0 = arith.constant 0 : i32
    return %arg0, %c0_i32 : i32, i32
  }
  func.func @transform_1(%arg0: i32) -> (i32, i32) {
    %c0_i32 = arith.constant 0 : i32
    %c0_i32_0 = arith.constant 0 : i32
    %c0_i32_1 = arith.constant 0 : i32
    return %c0_i32, %c0_i32_0 : i32, i32
  }
  func.func @transform_2(%arg0: i32) -> (i32, i32) {
    %c0_i32 = arith.constant 0 : i32
    %c0_i32_0 = arith.constant 0 : i32
    %c0_i32_1 = arith.constant 0 : i32
    return %c0_i32, %c0_i32_0 : i32, i32
  }
  func.func @transform_3(%arg0: i32) -> (i32, i32) {
    %c0_i32 = arith.constant 0 : i32
    %c0_i32_0 = arith.constant 0 : i32
    %c0_i32_1 = arith.constant 0 : i32
    return %c0_i32, %c0_i32_0 : i32, i32
  }
  func.func @transform_4(%arg0: i32) -> (i32, i32) {
    %c0_i32 = arith.constant 0 : i32
    %c0_i32_0 = arith.constant 0 : i32
    %c0_i32_1 = arith.constant 0 : i32
    return %c0_i32, %c0_i32_0 : i32, i32
  }
  func.func @transform_5(%arg0: i32) -> (i32, i32) {
    %c0_i32 = arith.constant 0 : i32
    %c0_i32_0 = arith.constant 0 : i32
    %c0_i32_1 = arith.constant 0 : i32
    return %c0_i32, %c0_i32_0 : i32, i32
  }
  func.func @transform_6(%arg0: i32) -> (i32, i32) {
    %c0_i32 = arith.constant 0 : i32
    %c0_i32_0 = arith.constant 0 : i32
    %c0_i32_1 = arith.constant 0 : i32
    return %c0_i32, %c0_i32_0 : i32, i32
  }
  func.func @transform_7(%arg0: i32) -> (i32, i32) {
    %c0_i32 = arith.constant 0 : i32
    %c0_i32_0 = arith.constant 0 : i32
    %c0_i32_1 = arith.constant 0 : i32
    return %c0_i32, %c0_i32_0 : i32, i32
  }
  func.func @transform_8(%arg0: i32) -> (i32, i32) {
    %c0_i32 = arith.constant 0 : i32
    %c0_i32_0 = arith.constant 0 : i32
    %c0_i32_1 = arith.constant 0 : i32
    return %c0_i32, %c0_i32_0 : i32, i32
  }
  func.func @transform_9(%arg0: i32) -> (i32, i32) {
    %c0_i32 = arith.constant 0 : i32
    %c0_i32_0 = arith.constant 0 : i32
    return %arg0, %c0_i32 : i32, i32
  }
}

module attributes {stable_mosaic.version = 11 : i64} {
  func.func @kernel(%arg0: i32, %arg1: memref<128x128xbf16, #tpu.memory_space<vmem>>, %arg2: memref<128x128xbf16, #tpu.memory_space<vmem>>, %arg3: memref<128x128xbf16, #tpu.memory_space<vmem>>, %arg4: memref<1x128xf32, #tpu.memory_space<vmem>>, %arg5: memref<1x128xf32, #tpu.memory_space<vmem>>, %arg6: memref<128x128xbf16, #tpu.memory_space<vmem>>, %arg7: memref<128x128xbf16, #tpu.memory_space<vmem>>, %arg8: memref<1x128xf32, #tpu.memory_space<vmem>>, %arg9: memref<1x128xf32, #tpu.memory_space<vmem>>, %arg10: memref<128x128xf32, #tpu.memory_space<vmem>>) attributes {dimension_semantics = [#tpu.dimension_semantics<parallel>], iteration_bounds = array<i64: 2>, scalar_prefetch = 0 : i64, scratch_operands = 0 : i64, tpu.core_type = #tpu.core_type<tc>, window_params = [{transform_indices = @transform_0, window_bounds = array<i64: 128, 128>}, {pipeline_mode = #tpu.pipeline_mode<synchronous>, transform_indices = @transform_1, window_bounds = array<i64: 128, 128>}, {pipeline_mode = #tpu.pipeline_mode<synchronous>, transform_indices = @transform_2, window_bounds = array<i64: 128, 128>}, {pipeline_mode = #tpu.pipeline_mode<synchronous>, transform_indices = @transform_3, window_bounds = array<i64: 1, 128>}, {pipeline_mode = #tpu.pipeline_mode<synchronous>, transform_indices = @transform_4, window_bounds = array<i64: 1, 128>}, {pipeline_mode = #tpu.pipeline_mode<synchronous>, transform_indices = @transform_5, window_bounds = array<i64: 128, 128>}, {pipeline_mode = #tpu.pipeline_mode<synchronous>, transform_indices = @transform_6, window_bounds = array<i64: 128, 128>}, {pipeline_mode = #tpu.pipeline_mode<synchronous>, transform_indices = @transform_7, window_bounds = array<i64: 1, 128>}, {pipeline_mode = #tpu.pipeline_mode<synchronous>, transform_indices = @transform_8, window_bounds = array<i64: 1, 128>}, {transform_indices = @transform_9, window_bounds = array<i64: 128, 128>}]} {
    %c0 = arith.constant 0 : index
    %c0_0 = arith.constant 0 : index
    %0 = vector.load %arg1[%c0, %c0_0] : memref<128x128xbf16, #tpu.memory_space<vmem>>, vector<128x128xbf16>
    %c0_1 = arith.constant 0 : index
    %c0_2 = arith.constant 0 : index
    %1 = vector.load %arg2[%c0_1, %c0_2] : memref<128x128xbf16, #tpu.memory_space<vmem>>, vector<128x128xbf16>
    %c0_3 = arith.constant 0 : index
    %c0_4 = arith.constant 0 : index
    %2 = vector.load %arg4[%c0_3, %c0_4] : memref<1x128xf32, #tpu.memory_space<vmem>>, vector<1x128xf32>
    %cst = arith.constant dense<0.000000e+00> : vector<128x128xf32>
    %3 = tpu.matmul %0, %1, %cst {dimension_numbers = #tpu.dot_dimension_numbers<[1], [0], [0], [1], [0, 0, 1, 1], [], []>} : vector<128x128xbf16>, vector<128x128xbf16>, vector<128x128xf32> -> vector<128x128xf32>
    %4 = vector.broadcast %2 : vector<1x128xf32> to vector<128x128xf32>
    %5 = arith.addf %3, %4 : vector<128x128xf32>
    %cst_5 = arith.constant 0.000000e+00 : f32
    %6 = vector.broadcast %cst_5 : f32 to vector<128x128xf32>
    %7 = arith.subf %6, %5 : vector<128x128xf32>
    %8 = math.exp %7 : vector<128x128xf32>
    %cst_6 = arith.constant 1.000000e+00 : f32
    %9 = vector.broadcast %cst_6 : f32 to vector<128x128xf32>
    %10 = arith.addf %9, %8 : vector<128x128xf32>
    %11 = tpu.reciprocal %10 {approx = true} : vector<128x128xf32> -> vector<128x128xf32>
    %12 = arith.truncf %11 : vector<128x128xf32> to vector<128x128xbf16>
    %c0_7 = arith.constant 0 : index
    %c0_8 = arith.constant 0 : index
    %13 = vector.load %arg6[%c0_7, %c0_8] : memref<128x128xbf16, #tpu.memory_space<vmem>>, vector<128x128xbf16>
    %c0_9 = arith.constant 0 : index
    %c0_10 = arith.constant 0 : index
    %14 = vector.load %arg8[%c0_9, %c0_10] : memref<1x128xf32, #tpu.memory_space<vmem>>, vector<1x128xf32>
    %cst_11 = arith.constant dense<0.000000e+00> : vector<128x128xf32>
    %15 = tpu.matmul %12, %13, %cst_11 {dimension_numbers = #tpu.dot_dimension_numbers<[1], [0], [0], [1], [0, 0, 1, 1], [], []>} : vector<128x128xbf16>, vector<128x128xbf16>, vector<128x128xf32> -> vector<128x128xf32>
    %16 = vector.broadcast %14 : vector<1x128xf32> to vector<128x128xf32>
    %17 = arith.addf %15, %16 : vector<128x128xf32>
    %cst_12 = arith.constant 0.000000e+00 : f32
    %18 = vector.broadcast %cst_12 : f32 to vector<128x128xf32>
    %19 = arith.subf %18, %17 : vector<128x128xf32>
    %20 = math.exp %19 : vector<128x128xf32>
    %cst_13 = arith.constant 1.000000e+00 : f32
    %21 = vector.broadcast %cst_13 : f32 to vector<128x128xf32>
    %22 = arith.addf %21, %20 : vector<128x128xf32>
    %23 = tpu.reciprocal %22 {approx = true} : vector<128x128xf32> -> vector<128x128xf32>
    %24 = arith.truncf %23 : vector<128x128xf32> to vector<128x128xbf16>
    %c0_14 = arith.constant 0 : index
    %c0_15 = arith.constant 0 : index
    %25 = vector.load %arg7[%c0_14, %c0_15] : memref<128x128xbf16, #tpu.memory_space<vmem>>, vector<128x128xbf16>
    %c0_16 = arith.constant 0 : index
    %c0_17 = arith.constant 0 : index
    %26 = vector.load %arg9[%c0_16, %c0_17] : memref<1x128xf32, #tpu.memory_space<vmem>>, vector<1x128xf32>
    %cst_18 = arith.constant dense<0.000000e+00> : vector<128x128xf32>
    %27 = tpu.matmul %24, %25, %cst_18 {dimension_numbers = #tpu.dot_dimension_numbers<[1], [0], [0], [1], [0, 0, 1, 1], [], []>} : vector<128x128xbf16>, vector<128x128xbf16>, vector<128x128xf32> -> vector<128x128xf32>
    %28 = vector.broadcast %26 : vector<1x128xf32> to vector<128x128xf32>
    %29 = arith.addf %27, %28 : vector<128x128xf32>
    %cst_19 = arith.constant 0.000000e+00 : f32
    %30 = vector.broadcast %cst_19 : f32 to vector<128x128xf32>
    %31 = arith.subf %30, %29 : vector<128x128xf32>
    %32 = math.exp %31 : vector<128x128xf32>
    %cst_20 = arith.constant 1.000000e+00 : f32
    %33 = vector.broadcast %cst_20 : f32 to vector<128x128xf32>
    %34 = arith.addf %33, %32 : vector<128x128xf32>
    %35 = tpu.reciprocal %34 {approx = true} : vector<128x128xf32> -> vector<128x128xf32>
    %36 = arith.truncf %35 : vector<128x128xf32> to vector<128x128xbf16>
    %c0_21 = arith.constant 0 : index
    %c0_22 = arith.constant 0 : index
    %37 = vector.load %arg3[%c0_21, %c0_22] : memref<128x128xbf16, #tpu.memory_space<vmem>>, vector<128x128xbf16>
    %c0_23 = arith.constant 0 : index
    %c0_24 = arith.constant 0 : index
    %38 = vector.load %arg5[%c0_23, %c0_24] : memref<1x128xf32, #tpu.memory_space<vmem>>, vector<1x128xf32>
    %cst_25 = arith.constant dense<0.000000e+00> : vector<128x128xf32>
    %39 = tpu.matmul %36, %37, %cst_25 {dimension_numbers = #tpu.dot_dimension_numbers<[1], [0], [0], [1], [0, 0, 1, 1], [], []>} : vector<128x128xbf16>, vector<128x128xbf16>, vector<128x128xf32> -> vector<128x128xf32>
    %40 = vector.broadcast %38 : vector<1x128xf32> to vector<128x128xf32>
    %41 = arith.addf %39, %40 : vector<128x128xf32>
    %cst_26 = arith.constant 0.000000e+00 : f32
    %42 = vector.broadcast %cst_26 : f32 to vector<128x128xf32>
    %43 = arith.subf %42, %41 : vector<128x128xf32>
    %44 = math.exp %43 : vector<128x128xf32>
    %cst_27 = arith.constant 1.000000e+00 : f32
    %45 = vector.broadcast %cst_27 : f32 to vector<128x128xf32>
    %46 = arith.addf %45, %44 : vector<128x128xf32>
    %47 = tpu.reciprocal %46 {approx = true} : vector<128x128xf32> -> vector<128x128xf32>
    %c0_28 = arith.constant 0 : index
    %c0_29 = arith.constant 0 : index
    %48 = vector.load %arg10[%c0_28, %c0_29] : memref<128x128xf32, #tpu.memory_space<vmem>>, vector<128x128xf32>
    tpu.vector_store %arg10[%c0_28, %c0_29], %47 {strides = array<i32>} : memref<128x128xf32, #tpu.memory_space<vmem>>, vector<128x128xf32>,
    return
  }
  func.func @transform_0(%arg0: i32) -> (i32, i32) {
    %c0_i32 = arith.constant 0 : i32
    %c0_i32_0 = arith.constant 0 : i32
    return %arg0, %c0_i32 : i32, i32
  }
  func.func @transform_1(%arg0: i32) -> (i32, i32) {
    %c0_i32 = arith.constant 0 : i32
    %c0_i32_0 = arith.constant 0 : i32
    %c0_i32_1 = arith.constant 0 : i32
    return %c0_i32, %c0_i32_0 : i32, i32
  }
  func.func @transform_2(%arg0: i32) -> (i32, i32) {
    %c0_i32 = arith.constant 0 : i32
    %c0_i32_0 = arith.constant 0 : i32
    %c0_i32_1 = arith.constant 0 : i32
    return %c0_i32, %c0_i32_0 : i32, i32
  }
  func.func @transform_3(%arg0: i32) -> (i32, i32) {
    %c0_i32 = arith.constant 0 : i32
    %c0_i32_0 = arith.constant 0 : i32
    %c0_i32_1 = arith.constant 0 : i32
    return %c0_i32, %c0_i32_0 : i32, i32
  }
  func.func @transform_4(%arg0: i32) -> (i32, i32) {
    %c0_i32 = arith.constant 0 : i32
    %c0_i32_0 = arith.constant 0 : i32
    %c0_i32_1 = arith.constant 0 : i32
    return %c0_i32, %c0_i32_0 : i32, i32
  }
  func.func @transform_5(%arg0: i32) -> (i32, i32) {
    %c0_i32 = arith.constant 0 : i32
    %c0_i32_0 = arith.constant 0 : i32
    %c0_i32_1 = arith.constant 0 : i32
    return %c0_i32, %c0_i32_0 : i32, i32
  }
  func.func @transform_6(%arg0: i32) -> (i32, i32) {
    %c0_i32 = arith.constant 0 : i32
    %c0_i32_0 = arith.constant 0 : i32
    %c0_i32_1 = arith.constant 0 : i32
    return %c0_i32, %c0_i32_0 : i32, i32
  }
  func.func @transform_7(%arg0: i32) -> (i32, i32) {
    %c0_i32 = arith.constant 0 : i32
    %c0_i32_0 = arith.constant 0 : i32
    %c0_i32_1 = arith.constant 0 : i32
    return %c0_i32, %c0_i32_0 : i32, i32
  }
  func.func @transform_8(%arg0: i32) -> (i32, i32) {
    %c0_i32 = arith.constant 0 : i32
    %c0_i32_0 = arith.constant 0 : i32
    %c0_i32_1 = arith.constant 0 : i32
    return %c0_i32, %c0_i32_0 : i32, i32
  }
  func.func @transform_9(%arg0: i32) -> (i32, i32) {
    %c0_i32 = arith.constant 0 : i32
    %c0_i32_0 = arith.constant 0 : i32
    return %arg0, %c0_i32 : i32, i32
  }
}

</mosaic_0001>

<bundles_post_ra>
// kernel: _dbn_forward_jit.1
= control target key start
LH: loop header
LB: loop body
LE: loop exit
PB: predicated region body
PF: predicated region fallthrough
CT: control target
= control target key end

     0   :  { %s2098_s30 = smov 0   ;;  %s2327_s0 = inlined_call_operand.vmem [shape: bf16[256,128], index: 0, kind: input, shape index: {}]   ;;  %s2328_s1 = inlined_call_operand.vmem [shape: bf16[128,128], index: 1, kind: input, shape index: {}]   ;;  %s2329_s2 = inlined_call_operand.vmem [shape: bf16[128,128], index: 2, kind: input, shape index: {}]   ;;  %s2330_s3 = inlined_call_operand.vmem [shape: f32[1,128], index: 3, kind: input, shape index: {}]   ;;  %s2331_s4 = inlined_call_operand.vmem [shape: f32[1,128], index: 4, kind: input, shape index: {}]   ;;  %s2332_s5 = inlined_call_operand.vmem [shape: bf16[128,128], index: 5, kind: input, shape index: {}]   ;;  %s2333_s6 = inlined_call_operand.vmem [shape: bf16[128,128], index: 6, kind: input, shape index: {}]   ;;  %s2334_s7 = inlined_call_operand.vmem [shape: f32[1,128], index: 7, kind: input, shape index: {}]   ;;  %s2335_s8 = inlined_call_operand.vmem [shape: f32[1,128], index: 8, kind: input, shape index: {}]   ;;  %s2336_s9 = inlined_call_operand.vmem [shape: f32[256,128], index: 9, kind: output, shape index: {}]  }
   0x1 LB: > { %s1489_s10 = sadd.s32 4294967295, %s2046_s30   ;;  %p1493_p0 = scmp.ge.s32.totalorder %s2046_s30, 1  ;;  %s2046_s30 = sphi %s2098_s30, %s19_s30  }
   0x2   : > { %p288_p1 = scmp.lt.s32.totalorder %s2046_s30, 3 }
   0x4   : > { %p289_p2 = pnand %p1493_p0, %p288_p1 }
   0x5   : > { %v1744_v0 = vld [vmem:[%s2328_s1] sm:$0xff] (!%p289_p2)   ;;  %s1494_s13 = sshll.u32 (!%p289_p2), %s1489_s10, 4  ;;  %v1745_v1 = vld [vmem:[%s2328_s1 + $0x8] sm:$0xff] (!%p289_p2)   ;;  %v1746_v2 = vld [vmem:[%s2328_s1 + $0x10] sm:$0xff] (!%p289_p2)  }
   0x6   : > { %292 = sbr.rel (%p289_p2) target bundleno = 1053 (0x41d), region = 56  ;;  %p325_p3 = scmp.lt.s32.totalorder (!%p289_p2), %s1494_s13, 31  ;;  %1608 = vmatprep.subr.bf16.mxu0 (!%p289_p2), %v1744_v0  ;;  %v1747_v3 = vld [vmem:[%s2328_s1 + $0x18] sm:$0xff] (!%p289_p2)   ;;  %v1748_v5 = vld [vmem:[%s2328_s1 + $0x20] sm:$0xff] (!%p289_p2)   ;;  %v1749_v6 = vld [vmem:[%s2328_s1 + $0x28] sm:$0xff] (!%p289_p2)  }
   0x7   : > { %1609 = vmatpush3.bf16.msra.mxu0 (!%p289_p2), %v1744_v0  ;;  %v1750_v7 = vld [vmem:[%s2328_s1 + $0x30] sm:$0xff] (!%p289_p2)   ;;  %v1751_v8 = vld [vmem:[%s2328_s1 + $0x38] sm:$0xff] (!%p289_p2)   ;;  %v1760_v16 = vld [vmem:[%s2332_s5] sm:$0xff] (!%p289_p2)  }
   0x8   : > { %1610 = vmatprep.subr.bf16.mxu0 (!%p289_p2), %v1745_v1  ;;  %1640 = vmatprep.subr.bf16.mxu1 (!%p289_p2), %v1760_v16  ;;  %v1761_v17 = vld [vmem:[%s2332_s5 + $0x8] sm:$0xff] (!%p289_p2)   ;;  %v1762_v18 = vld [vmem:[%s2332_s5 + $0x10] sm:$0xff] (!%p289_p2)   ;;  %v1763_v19 = vld [vmem:[%s2332_s5 + $0x18] sm:$0xff] (!%p289_p2)  }
   0x9   : > { %1641 = vmatpush3.bf16.msra.mxu1 (!%p289_p2), %v1760_v16  ;;  %v1764_v20 = vld [vmem:[%s2332_s5 + $0x20] sm:$0xff] (!%p289_p2)   ;;  %v1765_v21 = vld [vmem:[%s2332_s5 + $0x28] sm:$0xff] (!%p289_p2)   ;;  %v1766_v22 = vld [vmem:[%s2332_s5 + $0x30] sm:$0xff] (!%p289_p2)  }
   0xa   : > { %1642 = vmatprep.subr.bf16.mxu1 (!%p289_p2), %v1761_v17  ;;  %v1767_v23 = vld [vmem:[%s2332_s5 + $0x38] sm:$0xff] (!%p289_p2)   ;;  %v2173_v24 = vld [vmem:[%s2330_s3] ss:$0 sm:$0xff] (!%p289_p2) }
   0xb   : > { %1611 = vmatpush3.bf16.msra.mxu0 (!%p289_p2), %v1745_v1 }
   0xc   : > { %1612 = vmatprep.subr.bf16.mxu0 (!%p289_p2), %v1746_v2 }
   0xd   : > { %s2338_s13 = smov (!%p325_p3, %s1494_s13), 31  ;;  %1643 = vmatpush3.bf16.msra.mxu1 %v1761_v17 }
   0xe   : > { %s1495_s18 = sshll.u32 %s2338_s13, 2  ;;  %1644 = vmatprep.subr.bf16.mxu1 %v1762_v18  ;;  %s1497_s11 = sshll.u32 %s2338_s13, 3 }
   0xf   : > { %s2121_s21 = scalar_lea.vmem %s2327_s0, %s1495_s18  ;;  %1613 = vmatpush3.bf16.msra.mxu0 %v1746_v2  ;;  %s2304_s13 = scalar_lea.vmem %s2336_s9, %s1497_s11 }
  0x10   : > { %v1752_v4 = vld [vmem:[%s2121_s21] sm:$0xff]   ;;  %1614 = vmatprep.subr.bf16.mxu0 %v1747_v3  ;;  %v1753_v9 = vld [vmem:[%s2121_s21 + $0x8] sm:$0xff]   ;;  %v1754_v10 = vld [vmem:[%s2121_s21 + $0x10] sm:$0xff]  }
  0x11   : > { %1624 = vmatprep.mubr.bf16.mxu0 %v1752_v4  ;;  %v1755_v11 = vld [vmem:[%s2121_s21 + $0x18] sm:$0xff]   ;;  %v1756_v12 = vld [vmem:[%s2121_s21 + $0x20] sm:$0xff]   ;;  %v1757_v13 = vld [vmem:[%s2121_s21 + $0x28] sm:$0xff]   ;;  %1645 = vmatpush3.bf16.msra.mxu1 %v1762_v18 }
  0x12   : > { %v1758_v14 = vld [vmem:[%s2121_s21 + $0x30] sm:$0xff]   ;;  %v1759_v15 = vld [vmem:[%s2121_s21 + $0x38] sm:$0xff]   ;;  %1646 = vmatprep.subr.bf16.mxu1 %v1763_v19 }
  0x13   : > { %1615 = vmatpush3.bf16.msra.mxu0 %v1747_v3 }
  0x14   : > { %1616 = vmatprep.subr.bf16.mxu0 %v1748_v5 }
  0x15   : > { %1647 = vmatpush3.bf16.msra.mxu1 %v1763_v19 }
  0x16   : > { %1648 = vmatprep.subr.bf16.mxu1 %v1764_v20 }
  0x17   : > { %1617 = vmatpush3.bf16.msra.mxu0 %v1748_v5 }
  0x18   : > { %1618 = vmatprep.subr.bf16.mxu0 %v1749_v6 }
  0x19   : > { %1649 = vmatpush3.bf16.msra.mxu1 %v1764_v20 }
  0x1a   : > { %1650 = vmatprep.subr.bf16.mxu1 %v1765_v21 }
  0x1b   : > { %1619 = vmatpush3.bf16.msra.mxu0 %v1749_v6 }
  0x1c   : > { %1620 = vmatprep.subr.bf16.mxu0 %v1750_v7 }
  0x1d   : > { %1651 = vmatpush3.bf16.msra.mxu1 %v1765_v21 }
  0x1e   : > { %1652 = vmatprep.subr.bf16.mxu1 %v1766_v22 }
  0x1f   : > { %1621 = vmatpush3.bf16.msra.mxu0 %v1750_v7 }
  0x20   : > { %1622 = vmatprep.subr.bf16.mxu0 %v1751_v8 }
  0x21   : > { %1653 = vmatpush3.bf16.msra.mxu1 %v1766_v22 }
  0x22   : > { %1654 = vmatprep.subr.bf16.mxu1 %v1767_v23 }
  0x23   : > { %1623 = vmatpush3.bf16.msra.mxu0 %v1751_v8 }
  0x25   : > { %1655 = vmatpush3.bf16.msra.mxu1 %v1767_v23 }
  0x26   : > { %1625 = vmatmul.mubr.bf16.vlgmr.msra.gmra.mrb[0].mxu0 %v1753_v9 }
  0x27   : > { %1628 = vmatprep.mubr.bf16.mxu0 %v1754_v10 }
  0x2e   : > { %1629 = vmatmul.mubr.bf16.gmra.mrb[4].mxu0 %v1755_v11 }
  0x2f   : > { %1632 = vmatprep.mubr.bf16.mxu0 %v1756_v12 }
  0x36   : > { %1633 = vmatmul.mubr.bf16.gmra.mrb[8].mxu0 %v1757_v13 }
  0x37   : > { %1636 = vmatprep.mubr.bf16.mxu0 %v1758_v14 }
  0x3e   : > { %1637 = vmatmul.mubr.bf16.gmra.mrb[12].mxu0 %v1759_v15 }
  0xf9   : > { %v1626_v25 = vpop.f32.mrb[0].mxu0 }
  0xfa   : > { %v515_v26 = vadd.f32 %v1626_v25, %v2173_v24  ;;  %v506_v27 = vpop.f32.mrb[1].mxu0 }
  0xfb   : > { %v507_v28 = vadd.f32 %v2173_v24, %v506_v27  ;;  %v1627_v29 = vpop.f32.mrb[2].mxu0 }
  0xfc   : > { %v571_v30 = vsub.f32 0.0, %v515_v26  ;;  %v518_v31 = vadd.f32 %v1627_v29, %v2173_v24  ;;  %v509_v32 = vpop.f32.mrb[3].mxu0 }
  0xfd   : > { %v569_v33 = vsub.f32 0.0, %v507_v28  ;;  %v510_v34 = vadd.f32 %v2173_v24, %v509_v32 }
  0xfe   : > { %v589_v35 = vmul.f32 1.442695, %v571_v30  ;;  %v572_v36 = vsub.f32 0.0, %v518_v31 }
  0xff   : > { %v585_v37 = vmul.f32 1.442695, %v569_v33  ;;  %v570_v38 = vsub.f32 0.0, %v510_v34 }
 0x100   : > { %1784 = vpow2.f32 %v589_v35  ;;  %v591_v39 = vmul.f32 1.442695, %v572_v36 }
 0x101   : > { %1786 = vpow2.f32 %v585_v37  ;;  %v587_v40 = vmul.f32 1.442695, %v570_v38  ;;  %v1630_v41 = vpop.f32.mrb[4].mxu0 }
 0x102   : > { %1788 = vpow2.f32 %v591_v39  ;;  %v531_v42 = vadd.f32 %v1630_v41, %v2173_v24  ;;  %v522_v43 = vpop.f32.mrb[5].mxu0 }
 0x103   : > { %1790 = vpow2.f32 %v587_v40  ;;  %v523_v44 = vadd.f32 %v2173_v24, %v522_v43  ;;  %v1631_v45 = vpop.f32.mrb[6].mxu0 }
 0x104   : > { %v575_v46 = vsub.f32 0.0, %v531_v42  ;;  %v534_v47 = vadd.f32 %v1631_v45, %v2173_v24  ;;  %v525_v48 = vpop.f32.mrb[7].mxu0 }
 0x105   : > { %v573_v49 = vsub.f32 0.0, %v523_v44  ;;  %v526_v50 = vadd.f32 %v2173_v24, %v525_v48 }
 0x106   : > { %v597_v51 = vmul.f32 1.442695, %v575_v46  ;;  %v576_v52 = vsub.f32 0.0, %v534_v47 }
 0x107   : > { %v593_v53 = vmul.f32 1.442695, %v573_v49  ;;  %v574_v54 = vsub.f32 0.0, %v526_v50 }
 0x108   : > { %1792 = vpow2.f32 %v597_v51  ;;  %v599_v55 = vmul.f32 1.442695, %v576_v52 }
 0x109   : > { %1794 = vpow2.f32 %v593_v53  ;;  %v595_v56 = vmul.f32 1.442695, %v574_v54  ;;  %v1634_v57 = vpop.f32.mrb[8].mxu0 }
 0x10a   : > { %v1785_v58 = vpop.eup %1784  ;;  %1796 = vpow2.f32 %v599_v55  ;;  %v547_v59 = vadd.f32 %v1634_v57, %v2173_v24  ;;  %v538_v60 = vpop.f32.mrb[9].mxu0 }
 0x10b   : > { %v1787_v61 = vpop.eup %1786  ;;  %v619_v62 = vadd.f32 1.0, %v1785_v58  ;;  %1798 = vpow2.f32 %v595_v56  ;;  %v539_v63 = vadd.f32 %v2173_v24, %v538_v60  ;;  %v1635_v0 = vpop.f32.mrb[10].mxu0 }
 0x10c   : > { %v1789_v1 = vpop.eup %1788  ;;  %v617_v2 = vadd.f32 1.0, %v1787_v61  ;;  %v579_v3 = vsub.f32 0.0, %v547_v59  ;;  %v550_v4 = vadd.f32 %v1635_v0, %v2173_v24  ;;  %v541_v5 = vpop.f32.mrb[11].mxu0 }
 0x10d   : > { %v1791_v6 = vpop.eup %1790  ;;  %1800 = vrcp.f32 %v619_v62  ;;  %v620_v7 = vadd.f32 1.0, %v1789_v1  ;;  %v577_v8 = vsub.f32 0.0, %v539_v63  ;;  %v542_v9 = vadd.f32 %v2173_v24, %v541_v5 }
 0x10e   : > { %1802 = vrcp.f32 %v617_v2  ;;  %v618_v10 = vadd.f32 1.0, %v1791_v6  ;;  %v605_v11 = vmul.f32 1.442695, %v579_v3  ;;  %v580_v12 = vsub.f32 0.0, %v550_v4 }
 0x10f   : > { %1804 = vrcp.f32 %v620_v7  ;;  %v601_v13 = vmul.f32 1.442695, %v577_v8  ;;  %v578_v14 = vsub.f32 0.0, %v542_v9 }
 0x110   : > { %1806 = vrcp.f32 %v618_v10  ;;  %v607_v15 = vmul.f32 1.442695, %v580_v12 }
 0x111   : > { %1808 = vpow2.f32 %v605_v11  ;;  %v603_v16 = vmul.f32 1.442695, %v578_v14  ;;  %v1638_v17 = vpop.f32.mrb[12].mxu0 }
 0x112   : > { %v1793_v18 = vpop.eup %1792  ;;  %1810 = vpow2.f32 %v601_v13  ;;  %v563_v19 = vadd.f32 %v1638_v17, %v2173_v24  ;;  %v554_v20 = vpop.f32.mrb[13].mxu0  ;;  %v1768_v17 = vld [vmem:[%s2333_s6] sm:$0xff]  }
 0x113   : > { %v1795_v21 = vpop.eup %1794  ;;  %v623_v22 = vadd.f32 1.0, %v1793_v18  ;;  %1812 = vpow2.f32 %v607_v15  ;;  %v555_v23 = vadd.f32 %v2173_v24, %v554_v20  ;;  %v1639_v25 = vpop.f32.mrb[14].mxu0  ;;  %1672 = vmatprep.subr.bf16.mxu0 %v1768_v17  ;;  %v1769_v18 = vld [vmem:[%s2333_s6 + $0x8] sm:$0xff]   ;;  %v1771_v20 = vld [vmem:[%s2333_s6 + $0x18] sm:$0xff]  }
 0x114   : > { %v1797_v26 = vpop.eup %1796  ;;  %v621_v27 = vadd.f32 1.0, %v1795_v21  ;;  %1814 = vpow2.f32 %v603_v16  ;;  %v583_v28 = vsub.f32 0.0, %v563_v19  ;;  %v566_v29 = vadd.f32 %v1639_v25, %v2173_v24  ;;  %v557_v30 = vpop.f32.mrb[15].mxu0  ;;  %1673 = vmatpush3.bf16.msra.mxu0 %v1768_v17  ;;  %v1770_v19 = vld [vmem:[%s2333_s6 + $0x10] sm:$0xff]   ;;  %v1772_v21 = vld [vmem:[%s2333_s6 + $0x20] sm:$0xff]   ;;  %v1775_v25 = vld [vmem:[%s2333_s6 + $0x38] sm:$0xff]  }
 0x115   : > { %v1799_v31 = vpop.eup %1798  ;;  %1816 = vrcp.f32 %v623_v22  ;;  %v624_v32 = vadd.f32 1.0, %v1797_v26  ;;  %v581_v33 = vsub.f32 0.0, %v555_v23  ;;  %v558_v34 = vadd.f32 %v2173_v24, %v557_v30  ;;  %1674 = vmatprep.subr.bf16.mxu0 %v1769_v18  ;;  %v1773_v22 = vld [vmem:[%s2333_s6 + $0x28] sm:$0xff]   ;;  %v1774_v23 = vld [vmem:[%s2333_s6 + $0x30] sm:$0xff]   ;;  %v2218_v26 = vld [vmem:[%s2334_s7] ss:$0 sm:$0xff] }
 0x116   : > { %1818 = vrcp.f32 %v621_v27  ;;  %v622_v35 = vadd.f32 1.0, %v1799_v31  ;;  %v613_v36 = vmul.f32 1.442695, %v583_v28  ;;  %v584_v37 = vsub.f32 0.0, %v566_v29 }
 0x117   : > { %v1801_v38 = vpop.eup %1800  ;;  %1820 = vrcp.f32 %v624_v32  ;;  %v609_v39 = vmul.f32 1.442695, %v581_v33  ;;  %v582_v40 = vsub.f32 0.0, %v558_v34 }
 0x118   : > { %v1803_v41 = vpop.eup %1802  ;;  %1822 = vrcp.f32 %v622_v35  ;;  %v615_v42 = vmul.f32 1.442695, %v584_v37  ;;  %1675 = vmatpush3.bf16.msra.mxu0 %v1769_v18 }
 0x119   : > { %v1805_v43 = vpop.eup %1804  ;;  %1824 = vpow2.f32 %v613_v36  ;;  %v611_v44 = vmul.f32 1.442695, %v582_v40  ;;  %1676 = vmatprep.subr.bf16.mxu0 %v1770_v19 }
 0x11a   : > { %v1807_v45 = vpop.eup %1806  ;;  %1826 = vpow2.f32 %v609_v39  ;;  %v650_v46 = vpack.c.bf16 %v1805_v43, %v1801_v38 }
 0x11b   : > { %v1809_v47 = vpop.eup %1808  ;;  %1828 = vpow2.f32 %v615_v42  ;;  %v649_v24 = vpack.c.bf16 %v1807_v45, %v1803_v41 }
 0x11c   : > { %v1811_v48 = vpop.eup %1810  ;;  %v627_v49 = vadd.f32 1.0, %v1809_v47  ;;  %1830 = vpow2.f32 %v611_v44  ;;  %1677 = vmatpush3.bf16.msra.mxu0 %v1770_v19 }
 0x11d   : > { %v1813_v50 = vpop.eup %1812  ;;  %v625_v51 = vadd.f32 1.0, %v1811_v48  ;;  %1656 = vmatprep.mubr.bf16.mxu1 %v649_v24  ;;  %1678 = vmatprep.subr.bf16.mxu0 %v1771_v20 }
 0x11e   : > { %v1815_v52 = vpop.eup %1814  ;;  %1832 = vrcp.f32 %v627_v49  ;;  %v628_v53 = vadd.f32 1.0, %v1813_v50  ;;  %1657 = vmatmul.mubr.bf16.vlgmr.msra.gmra.mrb[0].mxu1 %v650_v46 }
 0x11f   : > { %v1817_v54 = vpop.eup %1816  ;;  %1834 = vrcp.f32 %v625_v51  ;;  %v626_v55 = vadd.f32 1.0, %v1815_v52 }
 0x120   : > { %v1819_v56 = vpop.eup %1818  ;;  %1836 = vrcp.f32 %v628_v53  ;;  %1679 = vmatpush3.bf16.msra.mxu0 %v1771_v20 }
 0x121   : > { %v1821_v57 = vpop.eup %1820  ;;  %1838 = vrcp.f32 %v626_v55  ;;  %1680 = vmatprep.subr.bf16.mxu0 %v1772_v21 }
 0x122   : > { %v1823_v58 = vpop.eup %1822  ;;  %v652_v59 = vpack.c.bf16 %v1821_v57, %v1817_v54 }
 0x123   : > { %v1825_v60 = vpop.eup %1824  ;;  %v651_v61 = vpack.c.bf16 %v1823_v58, %v1819_v56 }
 0x124   : > { %v1827_v62 = vpop.eup %1826  ;;  %v631_v63 = vadd.f32 1.0, %v1825_v60  ;;  %1681 = vmatpush3.bf16.msra.mxu0 %v1772_v21 }
 0x125   : > { %v1829_v0 = vpop.eup %1828  ;;  %v629_v1 = vadd.f32 1.0, %v1827_v62  ;;  %1660 = vmatprep.mubr.bf16.mxu1 %v651_v61  ;;  %1682 = vmatprep.subr.bf16.mxu0 %v1773_v22 }
 0x126   : > { %v1831_v2 = vpop.eup %1830  ;;  %1840 = vrcp.f32 %v631_v63  ;;  %v632_v3 = vadd.f32 1.0, %v1829_v0  ;;  %1661 = vmatmul.mubr.bf16.gmra.mrb[4].mxu1 %v652_v59 }
 0x127   : > { %1842 = vrcp.f32 %v629_v1  ;;  %v630_v4 = vadd.f32 1.0, %v1831_v2 }
 0x128   : > { %v1833_v5 = vpop.eup %1832  ;;  %1844 = vrcp.f32 %v632_v3  ;;  %1683 = vmatpush3.bf16.msra.mxu0 %v1773_v22 }
 0x129   : > { %v1835_v6 = vpop.eup %1834  ;;  %1846 = vrcp.f32 %v630_v4  ;;  %1684 = vmatprep.subr.bf16.mxu0 %v1774_v23 }
 0x12a   : > { %v1837_v7 = vpop.eup %1836 }
 0x12b   : > { %v1839_v8 = vpop.eup %1838  ;;  %v654_v9 = vpack.c.bf16 %v1837_v7, %v1833_v5 }
 0x12c   : > { %v653_v10 = vpack.c.bf16 %v1839_v8, %v1835_v6  ;;  %1685 = vmatpush3.bf16.msra.mxu0 %v1774_v23 }
 0x12d   : > { %1686 = vmatprep.subr.bf16.mxu0 %v1775_v25 }
 0x12e   : > { %1664 = vmatprep.mubr.bf16.mxu1 %v653_v10 }
 0x12f   : > { %1665 = vmatmul.mubr.bf16.gmra.mrb[8].mxu1 %v654_v9 }
 0x130   : > { %v1841_v11 = vpop.eup %1840  ;;  %1687 = vmatpush3.bf16.msra.mxu0 %v1775_v25 }
 0x131   : > { %v1843_v12 = vpop.eup %1842 }
 0x132   : > { %v1845_v13 = vpop.eup %1844 }
 0x133   : > { %v1847_v14 = vpop.eup %1846  ;;  %v656_v15 = vpack.c.bf16 %v1845_v13, %v1841_v11 }
 0x134   : > { %v655_v16 = vpack.c.bf16 %v1847_v14, %v1843_v12 }
 0x136   : > { %1668 = vmatprep.mubr.bf16.mxu1 %v655_v16 }
 0x137   : > { %1669 = vmatmul.mubr.bf16.gmra.mrb[12].mxu1 %v656_v15 }
 0x1f1   : > { %v1658_v27 = vpop.f32.mrb[0].mxu1 }
 0x1f2   : > { %v771_v28 = vadd.f32 %v1658_v27, %v2218_v26  ;;  %v762_v29 = vpop.f32.mrb[1].mxu1 }
 0x1f3   : > { %v763_v30 = vadd.f32 %v2218_v26, %v762_v29  ;;  %v1659_v31 = vpop.f32.mrb[2].mxu1 }
 0x1f4   : > { %v827_v32 = vsub.f32 0.0, %v771_v28  ;;  %v774_v33 = vadd.f32 %v1659_v31, %v2218_v26  ;;  %v765_v34 = vpop.f32.mrb[3].mxu1 }
 0x1f5   : > { %v825_v35 = vsub.f32 0.0, %v763_v30  ;;  %v766_v36 = vadd.f32 %v2218_v26, %v765_v34 }
 0x1f6   : > { %v845_v37 = vmul.f32 1.442695, %v827_v32  ;;  %v828_v38 = vsub.f32 0.0, %v774_v33 }
 0x1f7   : > { %v841_v39 = vmul.f32 1.442695, %v825_v35  ;;  %v826_v40 = vsub.f32 0.0, %v766_v36 }
 0x1f8   : > { %1848 = vpow2.f32 %v845_v37  ;;  %v847_v41 = vmul.f32 1.442695, %v828_v38 }
 0x1f9   : > { %1850 = vpow2.f32 %v841_v39  ;;  %v843_v42 = vmul.f32 1.442695, %v826_v40  ;;  %v1662_v43 = vpop.f32.mrb[4].mxu1 }
 0x1fa   : > { %1852 = vpow2.f32 %v847_v41  ;;  %v787_v44 = vadd.f32 %v1662_v43, %v2218_v26  ;;  %v778_v45 = vpop.f32.mrb[5].mxu1 }
 0x1fb   : > { %1854 = vpow2.f32 %v843_v42  ;;  %v779_v46 = vadd.f32 %v2218_v26, %v778_v45  ;;  %v1663_v47 = vpop.f32.mrb[6].mxu1 }
 0x1fc   : > { %v831_v24 = vsub.f32 0.0, %v787_v44  ;;  %v790_v48 = vadd.f32 %v1663_v47, %v2218_v26  ;;  %v781_v49 = vpop.f32.mrb[7].mxu1 }
 0x1fd   : > { %v829_v50 = vsub.f32 0.0, %v779_v46  ;;  %v782_v51 = vadd.f32 %v2218_v26, %v781_v49 }
 0x1fe   : > { %v853_v52 = vmul.f32 1.442695, %v831_v24  ;;  %v832_v53 = vsub.f32 0.0, %v790_v48 }
 0x1ff   : > { %v849_v54 = vmul.f32 1.442695, %v829_v50  ;;  %v830_v55 = vsub.f32 0.0, %v782_v51 }
 0x200   : > { %1856 = vpow2.f32 %v853_v52  ;;  %v855_v56 = vmul.f32 1.442695, %v832_v53 }
 0x201   : > { %1858 = vpow2.f32 %v849_v54  ;;  %v851_v57 = vmul.f32 1.442695, %v830_v55 }
 0x202   : > { %v1849_v58 = vpop.eup %1848  ;;  %1860 = vpow2.f32 %v855_v56  ;;  %v1666_v59 = vpop.f32.mrb[8].mxu1 }
 0x203   : > { %v1851_v60 = vpop.eup %1850  ;;  %v875_v61 = vadd.f32 1.0, %v1849_v58  ;;  %1862 = vpow2.f32 %v851_v57  ;;  %v803_v62 = vadd.f32 %v1666_v59, %v2218_v26  ;;  %v794_v63 = vpop.f32.mrb[9].mxu1 }
 0x204   : > { %v1853_v0 = vpop.eup %1852  ;;  %v873_v1 = vadd.f32 1.0, %v1851_v60  ;;  %v795_v2 = vadd.f32 %v2218_v26, %v794_v63  ;;  %v1667_v3 = vpop.f32.mrb[10].mxu1 }
 0x205   : > { %v1855_v4 = vpop.eup %1854  ;;  %1864 = vrcp.f32 %v875_v61  ;;  %v876_v5 = vadd.f32 1.0, %v1853_v0  ;;  %v835_v6 = vsub.f32 0.0, %v803_v62  ;;  %v806_v7 = vadd.f32 %v1667_v3, %v2218_v26  ;;  %v797_v8 = vpop.f32.mrb[11].mxu1 }
 0x206   : > { %1866 = vrcp.f32 %v873_v1  ;;  %v874_v9 = vadd.f32 1.0, %v1855_v4  ;;  %v833_v10 = vsub.f32 0.0, %v795_v2  ;;  %v798_v11 = vadd.f32 %v2218_v26, %v797_v8 }
 0x207   : > { %1868 = vrcp.f32 %v876_v5  ;;  %v861_v12 = vmul.f32 1.442695, %v835_v6  ;;  %v836_v13 = vsub.f32 0.0, %v806_v7 }
 0x208   : > { %1870 = vrcp.f32 %v874_v9  ;;  %v857_v14 = vmul.f32 1.442695, %v833_v10  ;;  %v834_v15 = vsub.f32 0.0, %v798_v11 }
 0x209   : > { %1872 = vpow2.f32 %v861_v12  ;;  %v863_v16 = vmul.f32 1.442695, %v836_v13 }
 0x20a   : > { %v1857_v17 = vpop.eup %1856  ;;  %1874 = vpow2.f32 %v857_v14  ;;  %v859_v18 = vmul.f32 1.442695, %v834_v15  ;;  %v1670_v19 = vpop.f32.mrb[12].mxu1 }
 0x20b   : > { %v1859_v20 = vpop.eup %1858  ;;  %v879_v21 = vadd.f32 1.0, %v1857_v17  ;;  %1876 = vpow2.f32 %v863_v16  ;;  %v819_v22 = vadd.f32 %v1670_v19, %v2218_v26  ;;  %v810_v23 = vpop.f32.mrb[13].mxu1  ;;  %v1777_v19 = vld [vmem:[%s2329_s2 + $0x8] sm:$0xff]  }
 0x20c   : > { %v1861_v25 = vpop.eup %1860  ;;  %v877_v27 = vadd.f32 1.0, %v1859_v20  ;;  %1878 = vpow2.f32 %v859_v18  ;;  %v811_v28 = vadd.f32 %v2218_v26, %v810_v23  ;;  %v1671_v29 = vpop.f32.mrb[14].mxu1  ;;  %v1776_v18 = vld [vmem:[%s2329_s2] sm:$0xff]   ;;  %v1778_v20 = vld [vmem:[%s2329_s2 + $0x10] sm:$0xff]   ;;  %v1781_v23 = vld [vmem:[%s2329_s2 + $0x28] sm:$0xff]  }
 0x20d   : > { %v1863_v30 = vpop.eup %1862  ;;  %1880 = vrcp.f32 %v879_v21  ;;  %v880_v31 = vadd.f32 1.0, %v1861_v25  ;;  %v839_v32 = vsub.f32 0.0, %v819_v22  ;;  %v822_v33 = vadd.f32 %v1671_v29, %v2218_v26  ;;  %v813_v34 = vpop.f32.mrb[15].mxu1  ;;  %1704 = vmatprep.subr.bf16.mxu1 %v1776_v18  ;;  %v1779_v21 = vld [vmem:[%s2329_s2 + $0x18] sm:$0xff]   ;;  %v1780_v22 = vld [vmem:[%s2329_s2 + $0x20] sm:$0xff]   ;;  %v1782_v25 = vld [vmem:[%s2329_s2 + $0x30] sm:$0xff]  }
 0x20e   : > { %1882 = vrcp.f32 %v877_v27  ;;  %v878_v35 = vadd.f32 1.0, %v1863_v30  ;;  %v837_v36 = vsub.f32 0.0, %v811_v28  ;;  %v814_v37 = vadd.f32 %v2218_v26, %v813_v34  ;;  %1705 = vmatpush3.bf16.msra.mxu1 %v1776_v18  ;;  %v1783_v27 = vld [vmem:[%s2329_s2 + $0x38] sm:$0xff]   ;;  %v2263_v28 = vld [vmem:[%s2335_s8] ss:$0 sm:$0xff] }
 0x20f   : > { %v1865_v38 = vpop.eup %1864  ;;  %1884 = vrcp.f32 %v880_v31  ;;  %v869_v39 = vmul.f32 1.442695, %v839_v32  ;;  %v840_v40 = vsub.f32 0.0, %v822_v33  ;;  %1706 = vmatprep.subr.bf16.mxu1 %v1777_v19 }
 0x210   : > { %v1867_v41 = vpop.eup %1866  ;;  %1886 = vrcp.f32 %v878_v35  ;;  %v865_v42 = vmul.f32 1.442695, %v837_v36  ;;  %v838_v43 = vsub.f32 0.0, %v814_v37 }
 0x211   : > { %v1869_v44 = vpop.eup %1868  ;;  %1888 = vpow2.f32 %v869_v39  ;;  %v871_v45 = vmul.f32 1.442695, %v840_v40 }
 0x212   : > { %v1871_v46 = vpop.eup %1870  ;;  %1890 = vpow2.f32 %v865_v42  ;;  %v867_v47 = vmul.f32 1.442695, %v838_v43  ;;  %v906_v24 = vpack.c.bf16 %v1869_v44, %v1865_v38  ;;  %1707 = vmatpush3.bf16.msra.mxu1 %v1777_v19 }
 0x213   : > { %v1873_v48 = vpop.eup %1872  ;;  %1892 = vpow2.f32 %v871_v45  ;;  %v905_v49 = vpack.c.bf16 %v1871_v46, %v1867_v41  ;;  %1708 = vmatprep.subr.bf16.mxu1 %v1778_v20 }
 0x214   : > { %v1875_v50 = vpop.eup %1874  ;;  %v883_v26 = vadd.f32 1.0, %v1873_v48  ;;  %1894 = vpow2.f32 %v867_v47 }
 0x215   : > { %v1877_v51 = vpop.eup %1876  ;;  %v881_v52 = vadd.f32 1.0, %v1875_v50  ;;  %1688 = vmatprep.mubr.bf16.mxu0 %v905_v49 }
 0x216   : > { %v1879_v53 = vpop.eup %1878  ;;  %1896 = vrcp.f32 %v883_v26  ;;  %v884_v54 = vadd.f32 1.0, %v1877_v51  ;;  %1689 = vmatmul.mubr.bf16.vlgmr.msra.gmra.mrb[16].mxu0 %v906_v24  ;;  %1709 = vmatpush3.bf16.msra.mxu1 %v1778_v20 }
 0x217   : > { %v1881_v55 = vpop.eup %1880  ;;  %1898 = vrcp.f32 %v881_v52  ;;  %v882_v56 = vadd.f32 1.0, %v1879_v53  ;;  %1710 = vmatprep.subr.bf16.mxu1 %v1779_v21 }
 0x218   : > { %v1883_v57 = vpop.eup %1882  ;;  %1900 = vrcp.f32 %v884_v54 }
 0x219   : > { %v1885_v58 = vpop.eup %1884  ;;  %1902 = vrcp.f32 %v882_v56 }
 0x21a   : > { %v1887_v59 = vpop.eup %1886  ;;  %v908_v60 = vpack.c.bf16 %v1885_v58, %v1881_v55  ;;  %1711 = vmatpush3.bf16.msra.mxu1 %v1779_v21 }
 0x21b   : > { %v1889_v61 = vpop.eup %1888  ;;  %v907_v62 = vpack.c.bf16 %v1887_v59, %v1883_v57  ;;  %1712 = vmatprep.subr.bf16.mxu1 %v1780_v22 }
 0x21c   : > { %v1891_v63 = vpop.eup %1890  ;;  %v887_v0 = vadd.f32 1.0, %v1889_v61 }
 0x21d   : > { %v1893_v1 = vpop.eup %1892  ;;  %v885_v2 = vadd.f32 1.0, %v1891_v63  ;;  %1692 = vmatprep.mubr.bf16.mxu0 %v907_v62 }
 0x21e   : > { %v1895_v3 = vpop.eup %1894  ;;  %1904 = vrcp.f32 %v887_v0  ;;  %v888_v4 = vadd.f32 1.0, %v1893_v1  ;;  %1693 = vmatmul.mubr.bf16.gmra.mrb[20].mxu0 %v908_v60  ;;  %1713 = vmatpush3.bf16.msra.mxu1 %v1780_v22 }
 0x21f   : > { %1906 = vrcp.f32 %v885_v2  ;;  %v886_v5 = vadd.f32 1.0, %v1895_v3  ;;  %1714 = vmatprep.subr.bf16.mxu1 %v1781_v23 }
 0x220   : > { %v1897_v6 = vpop.eup %1896  ;;  %1908 = vrcp.f32 %v888_v4 }
 0x221   : > { %v1899_v7 = vpop.eup %1898  ;;  %1910 = vrcp.f32 %v886_v5 }
 0x222   : > { %v1901_v8 = vpop.eup %1900  ;;  %1715 = vmatpush3.bf16.msra.mxu1 %v1781_v23 }
 0x223   : > { %v1903_v9 = vpop.eup %1902  ;;  %v910_v10 = vpack.c.bf16 %v1901_v8, %v1897_v6  ;;  %1716 = vmatprep.subr.bf16.mxu1 %v1782_v25 }
 0x224   : > { %v909_v11 = vpack.c.bf16 %v1903_v9, %v1899_v7 }
 0x226   : > { %1696 = vmatprep.mubr.bf16.mxu0 %v909_v11  ;;  %1717 = vmatpush3.bf16.msra.mxu1 %v1782_v25 }
 0x227   : > { %1697 = vmatmul.mubr.bf16.gmra.mrb[24].mxu0 %v910_v10  ;;  %1718 = vmatprep.subr.bf16.mxu1 %v1783_v27 }
 0x228   : > { %v1905_v12 = vpop.eup %1904 }
 0x229   : > { %v1907_v13 = vpop.eup %1906 }
 0x22a   : > { %v1909_v14 = vpop.eup %1908  ;;  %1719 = vmatpush3.bf16.msra.mxu1 %v1783_v27 }
 0x22b   : > { %v1911_v15 = vpop.eup %1910  ;;  %v912_v16 = vpack.c.bf16 %v1909_v14, %v1905_v12 }
 0x22c   : > { %v911_v17 = vpack.c.bf16 %v1911_v15, %v1907_v13 }
 0x22e   : > { %1700 = vmatprep.mubr.bf16.mxu0 %v911_v17 }
 0x22f   : > { %1701 = vmatmul.mubr.bf16.gmra.mrb[28].mxu0 %v912_v16 }
 0x2e9   : > { %v1690_v29 = vpop.f32.mrb[16].mxu0 }
 0x2ea   : > { %v1027_v30 = vadd.f32 %v1690_v29, %v2263_v28  ;;  %v1018_v31 = vpop.f32.mrb[17].mxu0 }
 0x2eb   : > { %v1019_v32 = vadd.f32 %v2263_v28, %v1018_v31  ;;  %v1691_v33 = vpop.f32.mrb[18].mxu0 }
 0x2ec   : > { %v1083_v34 = vsub.f32 0.0, %v1027_v30  ;;  %v1030_v35 = vadd.f32 %v1691_v33, %v2263_v28  ;;  %v1021_v36 = vpop.f32.mrb[19].mxu0 }
 0x2ed   : > { %v1081_v37 = vsub.f32 0.0, %v1019_v32  ;;  %v1022_v38 = vadd.f32 %v2263_v28, %v1021_v36 }
 0x2ee   : > { %v1101_v39 = vmul.f32 1.442695, %v1083_v34  ;;  %v1084_v40 = vsub.f32 0.0, %v1030_v35 }
 0x2ef   : > { %v1097_v41 = vmul.f32 1.442695, %v1081_v37  ;;  %v1082_v42 = vsub.f32 0.0, %v1022_v38 }
 0x2f0   : > { %1912 = vpow2.f32 %v1101_v39  ;;  %v1103_v43 = vmul.f32 1.442695, %v1084_v40 }
 0x2f1   : > { %1914 = vpow2.f32 %v1097_v41  ;;  %v1099_v44 = vmul.f32 1.442695, %v1082_v42  ;;  %v1694_v45 = vpop.f32.mrb[20].mxu0 }
 0x2f2   : > { %1916 = vpow2.f32 %v1103_v43  ;;  %v1043_v46 = vadd.f32 %v1694_v45, %v2263_v28  ;;  %v1034_v47 = vpop.f32.mrb[21].mxu0 }
 0x2f3   : > { %1918 = vpow2.f32 %v1099_v44  ;;  %v1035_v24 = vadd.f32 %v2263_v28, %v1034_v47  ;;  %v1695_v48 = vpop.f32.mrb[22].mxu0 }
 0x2f4   : > { %v1087_v49 = vsub.f32 0.0, %v1043_v46  ;;  %v1046_v50 = vadd.f32 %v1695_v48, %v2263_v28  ;;  %v1037_v26 = vpop.f32.mrb[23].mxu0 }
 0x2f5   : > { %v1085_v51 = vsub.f32 0.0, %v1035_v24  ;;  %v1038_v52 = vadd.f32 %v2263_v28, %v1037_v26 }
 0x2f6   : > { %v1109_v53 = vmul.f32 1.442695, %v1087_v49  ;;  %v1088_v54 = vsub.f32 0.0, %v1046_v50 }
 0x2f7   : > { %v1105_v55 = vmul.f32 1.442695, %v1085_v51  ;;  %v1086_v56 = vsub.f32 0.0, %v1038_v52 }
 0x2f8   : > { %1920 = vpow2.f32 %v1109_v53  ;;  %v1111_v57 = vmul.f32 1.442695, %v1088_v54 }
 0x2f9   : > { %1922 = vpow2.f32 %v1105_v55  ;;  %v1107_v58 = vmul.f32 1.442695, %v1086_v56 }
 0x2fa   : > { %v1913_v59 = vpop.eup %1912  ;;  %1924 = vpow2.f32 %v1111_v57  ;;  %v1698_v60 = vpop.f32.mrb[24].mxu0 }
 0x2fb   : > { %v1915_v61 = vpop.eup %1914  ;;  %v1131_v62 = vadd.f32 1.0, %v1913_v59  ;;  %1926 = vpow2.f32 %v1107_v58  ;;  %v1059_v63 = vadd.f32 %v1698_v60, %v2263_v28  ;;  %v1050_v0 = vpop.f32.mrb[25].mxu0 }
 0x2fc   : > { %v1917_v1 = vpop.eup %1916  ;;  %v1129_v2 = vadd.f32 1.0, %v1915_v61  ;;  %v1051_v3 = vadd.f32 %v2263_v28, %v1050_v0  ;;  %v1699_v4 = vpop.f32.mrb[26].mxu0 }
 0x2fd   : > { %v1919_v5 = vpop.eup %1918  ;;  %1928 = vrcp.f32 %v1131_v62  ;;  %v1132_v6 = vadd.f32 1.0, %v1917_v1  ;;  %v1091_v7 = vsub.f32 0.0, %v1059_v63  ;;  %v1062_v8 = vadd.f32 %v1699_v4, %v2263_v28  ;;  %v1053_v9 = vpop.f32.mrb[27].mxu0 }
 0x2fe   : > { %1930 = vrcp.f32 %v1129_v2  ;;  %v1130_v10 = vadd.f32 1.0, %v1919_v5  ;;  %v1089_v11 = vsub.f32 0.0, %v1051_v3  ;;  %v1054_v12 = vadd.f32 %v2263_v28, %v1053_v9 }
 0x2ff   : > { %1932 = vrcp.f32 %v1132_v6  ;;  %v1117_v13 = vmul.f32 1.442695, %v1091_v7  ;;  %v1092_v14 = vsub.f32 0.0, %v1062_v8 }
 0x300   : > { %1934 = vrcp.f32 %v1130_v10  ;;  %v1113_v15 = vmul.f32 1.442695, %v1089_v11  ;;  %v1090_v16 = vsub.f32 0.0, %v1054_v12 }
 0x301   : > { %1936 = vpow2.f32 %v1117_v13  ;;  %v1119_v17 = vmul.f32 1.442695, %v1092_v14 }
 0x302   : > { %v1921_v18 = vpop.eup %1920  ;;  %1938 = vpow2.f32 %v1113_v15  ;;  %v1115_v19 = vmul.f32 1.442695, %v1090_v16  ;;  %v1702_v20 = vpop.f32.mrb[28].mxu0 }
 0x303   : > { %v1923_v21 = vpop.eup %1922  ;;  %v1135_v22 = vadd.f32 1.0, %v1921_v18  ;;  %1940 = vpow2.f32 %v1119_v17  ;;  %v1075_v23 = vadd.f32 %v1702_v20, %v2263_v28  ;;  %v1066_v25 = vpop.f32.mrb[29].mxu0 }
 0x304   : > { %v1925_v27 = vpop.eup %1924  ;;  %v1133_v29 = vadd.f32 1.0, %v1923_v21  ;;  %1942 = vpow2.f32 %v1115_v19  ;;  %v1067_v30 = vadd.f32 %v2263_v28, %v1066_v25  ;;  %v1703_v31 = vpop.f32.mrb[30].mxu0  ;;  %v2284_v19 = vld [vmem:[%s2331_s4] ss:$0 sm:$0xff] }
 0x305   : > { %v1927_v32 = vpop.eup %1926  ;;  %1944 = vrcp.f32 %v1135_v22  ;;  %v1136_v33 = vadd.f32 1.0, %v1925_v27  ;;  %v1095_v34 = vsub.f32 0.0, %v1075_v23  ;;  %v1078_v35 = vadd.f32 %v1703_v31, %v2263_v28  ;;  %v1069_v36 = vpop.f32.mrb[31].mxu0 }
 0x306   : > { %1946 = vrcp.f32 %v1133_v29  ;;  %v1134_v37 = vadd.f32 1.0, %v1927_v32  ;;  %v1093_v38 = vsub.f32 0.0, %v1067_v30  ;;  %v1070_v39 = vadd.f32 %v2263_v28, %v1069_v36 }
 0x307   : > { %v1929_v40 = vpop.eup %1928  ;;  %1948 = vrcp.f32 %v1136_v33  ;;  %v1125_v41 = vmul.f32 1.442695, %v1095_v34  ;;  %v1096_v42 = vsub.f32 0.0, %v1078_v35 }
 0x308   : > { %v1931_v43 = vpop.eup %1930  ;;  %1950 = vrcp.f32 %v1134_v37  ;;  %v1121_v44 = vmul.f32 1.442695, %v1093_v38  ;;  %v1094_v45 = vsub.f32 0.0, %v1070_v39 }
 0x309   : > { %v1933_v46 = vpop.eup %1932  ;;  %1952 = vpow2.f32 %v1125_v41  ;;  %v1127_v47 = vmul.f32 1.442695, %v1096_v42 }
 0x30a   : > { %v1935_v24 = vpop.eup %1934  ;;  %1954 = vpow2.f32 %v1121_v44  ;;  %v1123_v48 = vmul.f32 1.442695, %v1094_v45  ;;  %v1162_v49 = vpack.c.bf16 %v1933_v46, %v1929_v40 }
 0x30b   : > { %v1937_v50 = vpop.eup %1936  ;;  %1956 = vpow2.f32 %v1127_v47  ;;  %v1161_v26 = vpack.c.bf16 %v1935_v24, %v1931_v43 }
 0x30c   : > { %v1939_v51 = vpop.eup %1938  ;;  %v1139_v28 = vadd.f32 1.0, %v1937_v50  ;;  %1958 = vpow2.f32 %v1123_v48 }
 0x30d   : > { %v1941_v52 = vpop.eup %1940  ;;  %v1137_v53 = vadd.f32 1.0, %v1939_v51  ;;  %1720 = vmatprep.mubr.bf16.mxu1 %v1161_v26 }
 0x30e   : > { %v1943_v54 = vpop.eup %1942  ;;  %1960 = vrcp.f32 %v1139_v28  ;;  %v1140_v55 = vadd.f32 1.0, %v1941_v52  ;;  %1721 = vmatmul.mubr.bf16.vlgmr.msra.gmra.mrb[16].mxu1 %v1162_v49 }
 0x30f   : > { %v1945_v56 = vpop.eup %1944  ;;  %1962 = vrcp.f32 %v1137_v53  ;;  %v1138_v57 = vadd.f32 1.0, %v1943_v54 }
 0x310   : > { %v1947_v58 = vpop.eup %1946  ;;  %1964 = vrcp.f32 %v1140_v55 }
 0x311   : > { %v1949_v59 = vpop.eup %1948  ;;  %1966 = vrcp.f32 %v1138_v57 }
 0x312   : > { %v1951_v60 = vpop.eup %1950  ;;  %v1164_v61 = vpack.c.bf16 %v1949_v59, %v1945_v56 }
 0x313   : > { %v1953_v62 = vpop.eup %1952  ;;  %v1163_v63 = vpack.c.bf16 %v1951_v60, %v1947_v58 }
 0x314   : > { %v1955_v0 = vpop.eup %1954  ;;  %v1143_v1 = vadd.f32 1.0, %v1953_v62 }
 0x315   : > { %v1957_v2 = vpop.eup %1956  ;;  %v1141_v3 = vadd.f32 1.0, %v1955_v0  ;;  %1724 = vmatprep.mubr.bf16.mxu1 %v1163_v63 }
 0x316   : > { %v1959_v4 = vpop.eup %1958  ;;  %1968 = vrcp.f32 %v1143_v1  ;;  %v1144_v5 = vadd.f32 1.0, %v1957_v2  ;;  %1725 = vmatmul.mubr.bf16.gmra.mrb[20].mxu1 %v1164_v61 }
 0x317   : > { %1970 = vrcp.f32 %v1141_v3  ;;  %v1142_v6 = vadd.f32 1.0, %v1959_v4 }
 0x318   : > { %v1961_v7 = vpop.eup %1960  ;;  %1972 = vrcp.f32 %v1144_v5 }
 0x319   : > { %v1963_v8 = vpop.eup %1962  ;;  %1974 = vrcp.f32 %v1142_v6 }
 0x31a   : > { %v1965_v9 = vpop.eup %1964 }
 0x31b   : > { %v1967_v10 = vpop.eup %1966  ;;  %v1166_v11 = vpack.c.bf16 %v1965_v9, %v1961_v7 }
 0x31c   : > { %v1165_v12 = vpack.c.bf16 %v1967_v10, %v1963_v8 }
 0x31e   : > { %1728 = vmatprep.mubr.bf16.mxu1 %v1165_v12 }
 0x31f   : > { %1729 = vmatmul.mubr.bf16.gmra.mrb[24].mxu1 %v1166_v11 }
 0x320   : > { %v1969_v13 = vpop.eup %1968 }
 0x321   : > { %v1971_v14 = vpop.eup %1970 }
 0x322   : > { %v1973_v15 = vpop.eup %1972 }
 0x323   : > { %v1975_v16 = vpop.eup %1974  ;;  %v1168_v17 = vpack.c.bf16 %v1973_v15, %v1969_v13 }
 0x324   : > { %v1167_v18 = vpack.c.bf16 %v1975_v16, %v1971_v14 }
 0x326   : > { %1732 = vmatprep.mubr.bf16.mxu1 %v1167_v18 }
 0x327   : > { %1733 = vmatmul.mubr.bf16.gmra.mrb[28].mxu1 %v1168_v17 }
 0x3e1   : > { %v1722_v20 = vpop.f32.mrb[16].mxu1 }
 0x3e2   : > { %v1283_v21 = vadd.f32 %v1722_v20, %v2284_v19  ;;  %v1274_v22 = vpop.f32.mrb[17].mxu1 }
 0x3e3   : > { %v1275_v23 = vadd.f32 %v2284_v19, %v1274_v22  ;;  %v1723_v25 = vpop.f32.mrb[18].mxu1 }
 0x3e4   : > { %v1339_v27 = vsub.f32 0.0, %v1283_v21  ;;  %v1286_v29 = vadd.f32 %v1723_v25, %v2284_v19  ;;  %v1277_v30 = vpop.f32.mrb[19].mxu1 }
 0x3e5   : > { %v1337_v31 = vsub.f32 0.0, %v1275_v23  ;;  %v1278_v32 = vadd.f32 %v2284_v19, %v1277_v30 }
 0x3e6   : > { %v1357_v33 = vmul.f32 1.442695, %v1339_v27  ;;  %v1340_v34 = vsub.f32 0.0, %v1286_v29 }
 0x3e7   : > { %v1353_v35 = vmul.f32 1.442695, %v1337_v31  ;;  %v1338_v36 = vsub.f32 0.0, %v1278_v32 }
 0x3e8   : > { %1976 = vpow2.f32 %v1357_v33  ;;  %v1359_v37 = vmul.f32 1.442695, %v1340_v34 }
 0x3e9   : > { %1978 = vpow2.f32 %v1353_v35  ;;  %v1355_v38 = vmul.f32 1.442695, %v1338_v36  ;;  %v1726_v39 = vpop.f32.mrb[20].mxu1 }
 0x3ea   : > { %1980 = vpow2.f32 %v1359_v37  ;;  %v1299_v40 = vadd.f32 %v1726_v39, %v2284_v19  ;;  %v1290_v41 = vpop.f32.mrb[21].mxu1 }
 0x3eb   : > { %1982 = vpow2.f32 %v1355_v38  ;;  %v1291_v42 = vadd.f32 %v2284_v19, %v1290_v41  ;;  %v1727_v43 = vpop.f32.mrb[22].mxu1 }
 0x3ec   : > { %v1343_v44 = vsub.f32 0.0, %v1299_v40  ;;  %v1302_v45 = vadd.f32 %v1727_v43, %v2284_v19  ;;  %v1293_v46 = vpop.f32.mrb[23].mxu1 }
 0x3ed   : > { %v1341_v47 = vsub.f32 0.0, %v1291_v42  ;;  %v1294_v24 = vadd.f32 %v2284_v19, %v1293_v46 }
 0x3ee   : > { %v1365_v48 = vmul.f32 1.442695, %v1343_v44  ;;  %v1344_v49 = vsub.f32 0.0, %v1302_v45 }
 0x3ef   : > { %v1361_v50 = vmul.f32 1.442695, %v1341_v47  ;;  %v1342_v26 = vsub.f32 0.0, %v1294_v24 }
 0x3f0   : > { %1984 = vpow2.f32 %v1365_v48  ;;  %v1367_v51 = vmul.f32 1.442695, %v1344_v49 }
 0x3f1   : > { %1986 = vpow2.f32 %v1361_v50  ;;  %v1363_v28 = vmul.f32 1.442695, %v1342_v26 }
 0x3f2   : > { %v1977_v52 = vpop.eup %1976  ;;  %1988 = vpow2.f32 %v1367_v51  ;;  %v1730_v53 = vpop.f32.mrb[24].mxu1 }
 0x3f3   : > { %v1979_v54 = vpop.eup %1978  ;;  %v1387_v55 = vadd.f32 1.0, %v1977_v52  ;;  %1990 = vpow2.f32 %v1363_v28  ;;  %v1315_v56 = vadd.f32 %v1730_v53, %v2284_v19  ;;  %v1306_v57 = vpop.f32.mrb[25].mxu1 }
 0x3f4   : > { %v1981_v58 = vpop.eup %1980  ;;  %v1385_v59 = vadd.f32 1.0, %v1979_v54  ;;  %v1307_v60 = vadd.f32 %v2284_v19, %v1306_v57  ;;  %v1731_v61 = vpop.f32.mrb[26].mxu1 }
 0x3f5   : > { %v1983_v62 = vpop.eup %1982  ;;  %1992 = vrcp.f32 %v1387_v55  ;;  %v1388_v63 = vadd.f32 1.0, %v1981_v58  ;;  %v1347_v0 = vsub.f32 0.0, %v1315_v56  ;;  %v1318_v1 = vadd.f32 %v1731_v61, %v2284_v19  ;;  %v1309_v2 = vpop.f32.mrb[27].mxu1 }
 0x3f6   : > { %1994 = vrcp.f32 %v1385_v59  ;;  %v1386_v3 = vadd.f32 1.0, %v1983_v62  ;;  %v1345_v4 = vsub.f32 0.0, %v1307_v60  ;;  %v1310_v5 = vadd.f32 %v2284_v19, %v1309_v2 }
 0x3f7   : > { %1996 = vrcp.f32 %v1388_v63  ;;  %v1373_v6 = vmul.f32 1.442695, %v1347_v0  ;;  %v1348_v7 = vsub.f32 0.0, %v1318_v1 }
 0x3f8   : > { %1998 = vrcp.f32 %v1386_v3  ;;  %v1369_v8 = vmul.f32 1.442695, %v1345_v4  ;;  %v1346_v9 = vsub.f32 0.0, %v1310_v5 }
 0x3f9   : > { %2000 = vpow2.f32 %v1373_v6  ;;  %v1375_v10 = vmul.f32 1.442695, %v1348_v7 }
 0x3fa   : > { %v1985_v11 = vpop.eup %1984  ;;  %2002 = vpow2.f32 %v1369_v8  ;;  %v1371_v12 = vmul.f32 1.442695, %v1346_v9  ;;  %v1734_v13 = vpop.f32.mrb[28].mxu1 }
 0x3fb   : > { %v1987_v14 = vpop.eup %1986  ;;  %v1391_v15 = vadd.f32 1.0, %v1985_v11  ;;  %2004 = vpow2.f32 %v1375_v10  ;;  %v1331_v16 = vadd.f32 %v1734_v13, %v2284_v19  ;;  %v1322_v17 = vpop.f32.mrb[29].mxu1 }
 0x3fc   : > { %v1989_v18 = vpop.eup %1988  ;;  %v1389_v20 = vadd.f32 1.0, %v1987_v14  ;;  %2006 = vpow2.f32 %v1371_v12  ;;  %v1323_v21 = vadd.f32 %v2284_v19, %v1322_v17  ;;  %v1735_v22 = vpop.f32.mrb[30].mxu1 }
 0x3fd   : > { %v1991_v23 = vpop.eup %1990  ;;  %2008 = vrcp.f32 %v1391_v15  ;;  %v1392_v25 = vadd.f32 1.0, %v1989_v18  ;;  %v1351_v27 = vsub.f32 0.0, %v1331_v16  ;;  %v1334_v29 = vadd.f32 %v1735_v22, %v2284_v19  ;;  %v1325_v30 = vpop.f32.mrb[31].mxu1 }
 0x3fe   : > { %2010 = vrcp.f32 %v1389_v20  ;;  %v1390_v31 = vadd.f32 1.0, %v1991_v23  ;;  %v1349_v32 = vsub.f32 0.0, %v1323_v21  ;;  %v1326_v33 = vadd.f32 %v2284_v19, %v1325_v30 }
 0x3ff   : > { %v1993_v34 = vpop.eup %1992  ;;  %2012 = vrcp.f32 %v1392_v25  ;;  %v1381_v35 = vmul.f32 1.442695, %v1351_v27  ;;  %v1352_v36 = vsub.f32 0.0, %v1334_v29 }
 0x400   : > { %v1995_v37 = vpop.eup %1994  ;;  %1419 = vst [vmem:[%s2304_s13 + $0x10] sm:$0xff] %v1993_v34  ;;  %2014 = vrcp.f32 %v1390_v31  ;;  %v1377_v38 = vmul.f32 1.442695, %v1349_v32  ;;  %v1350_v39 = vsub.f32 0.0, %v1326_v33 }
 0x401   : > { %v1997_v40 = vpop.eup %1996  ;;  %1417 = vst [vmem:[%s2304_s13] sm:$0xff] %v1995_v37  ;;  %2016 = vpow2.f32 %v1381_v35  ;;  %v1383_v41 = vmul.f32 1.442695, %v1352_v36 }
 0x402   : > { %v1999_v42 = vpop.eup %1998  ;;  %1420 = vst [vmem:[%s2304_s13 + $0x18] sm:$0xff] %v1997_v40  ;;  %2018 = vpow2.f32 %v1377_v38  ;;  %v1379_v43 = vmul.f32 1.442695, %v1350_v39 }
 0x403   : > { %v2001_v19 = vpop.eup %2000  ;;  %1418 = vst [vmem:[%s2304_s13 + $0x8] sm:$0xff] %v1999_v42  ;;  %2020 = vpow2.f32 %v1383_v41 }
 0x404   : > { %v2003_v44 = vpop.eup %2002  ;;  %v1395_v45 = vadd.f32 1.0, %v2001_v19  ;;  %2022 = vpow2.f32 %v1379_v43 }
 0x405   : > { %v2005_v46 = vpop.eup %2004  ;;  %v1393_v47 = vadd.f32 1.0, %v2003_v44 }
 0x406   : > { %v2007_v24 = vpop.eup %2006  ;;  %2024 = vrcp.f32 %v1395_v45  ;;  %v1396_v48 = vadd.f32 1.0, %v2005_v46 }
 0x407   : > { %v2009_v49 = vpop.eup %2008  ;;  %2026 = vrcp.f32 %v1393_v47  ;;  %v1394_v50 = vadd.f32 1.0, %v2007_v24 }
 0x408   : > { %v2011_v26 = vpop.eup %2010  ;;  %1423 = vst [vmem:[%s2304_s13 + $0x30] sm:$0xff] %v2009_v49  ;;  %2028 = vrcp.f32 %v1396_v48 }
 0x409   : > { %v2013_v51 = vpop.eup %2012  ;;  %1421 = vst [vmem:[%s2304_s13 + $0x20] sm:$0xff] %v2011_v26  ;;  %2030 = vrcp.f32 %v1394_v50 }
 0x40a   : > { %v2015_v28 = vpop.eup %2014  ;;  %1424 = vst [vmem:[%s2304_s13 + $0x38] sm:$0xff] %v2013_v51 }
 0x40b   : > { %v2017_v52 = vpop.eup %2016  ;;  %1422 = vst [vmem:[%s2304_s13 + $0x28] sm:$0xff] %v2015_v28 }
 0x40c   : > { %v2019_v53 = vpop.eup %2018  ;;  %v1399_v54 = vadd.f32 1.0, %v2017_v52 }
 0x40d   : > { %v2021_v55 = vpop.eup %2020  ;;  %v1397_v56 = vadd.f32 1.0, %v2019_v53 }
 0x40e   : > { %v2023_v57 = vpop.eup %2022  ;;  %2032 = vrcp.f32 %v1399_v54  ;;  %v1400_v58 = vadd.f32 1.0, %v2021_v55 }
 0x40f   : > { %2034 = vrcp.f32 %v1397_v56  ;;  %v1398_v59 = vadd.f32 1.0, %v2023_v57 }
 0x410   : > { %v2025_v60 = vpop.eup %2024  ;;  %2036 = vrcp.f32 %v1400_v58 }
 0x411   : > { %v2027_v61 = vpop.eup %2026  ;;  %1427 = vst [vmem:[%s2304_s13 + $0x50] sm:$0xff] %v2025_v60  ;;  %2038 = vrcp.f32 %v1398_v59 }
 0x412   : > { %v2029_v62 = vpop.eup %2028  ;;  %1425 = vst [vmem:[%s2304_s13 + $0x40] sm:$0xff] %v2027_v61 }
 0x413   : > { %v2031_v63 = vpop.eup %2030  ;;  %1428 = vst [vmem:[%s2304_s13 + $0x58] sm:$0xff] %v2029_v62 }
 0x414   : > { %1426 = vst [vmem:[%s2304_s13 + $0x48] sm:$0xff] %v2031_v63 }
 0x418   : > { %v2033_v0 = vpop.eup %2032 }
 0x419   : > { %v2035_v1 = vpop.eup %2034  ;;  %1431 = vst [vmem:[%s2304_s13 + $0x70] sm:$0xff] %v2033_v0 }
 0x41a   : > { %v2037_v2 = vpop.eup %2036  ;;  %1429 = vst [vmem:[%s2304_s13 + $0x60] sm:$0xff] %v2035_v1 }
 0x41b   : > { %v2039_v3 = vpop.eup %2038  ;;  %1432 = vst [vmem:[%s2304_s13 + $0x78] sm:$0xff] %v2037_v2 }
 0x41c   : > { %1430 = vst [vmem:[%s2304_s13 + $0x68] sm:$0xff] %v2039_v3 }
 0x41d PF: > { %s19_s30 = sadd.s32 1, %s2046_s30  }
 0x41e   : > { %p16_p4 = scmp.ge.s32.totalorder %s19_s30, 4  }
 0x420   :  { %18 = sbr.rel (!%p16_p4) target bundleno = 1 (0x1), region = 86 }

// kernel: _dbn_forward_jit.1
= control target key start
LH: loop header
LB: loop body
LE: loop exit
PB: predicated region body
PF: predicated region fallthrough
CT: control target
= control target key end

     0   :  { %s2098_s30 = smov 0   ;;  %s2327_s0 = inlined_call_operand.vmem [shape: bf16[256,128], index: 0, kind: input, shape index: {}]   ;;  %s2328_s1 = inlined_call_operand.vmem [shape: bf16[128,128], index: 1, kind: input, shape index: {}]   ;;  %s2329_s2 = inlined_call_operand.vmem [shape: bf16[128,128], index: 2, kind: input, shape index: {}]   ;;  %s2330_s3 = inlined_call_operand.vmem [shape: f32[1,128], index: 3, kind: input, shape index: {}]   ;;  %s2331_s4 = inlined_call_operand.vmem [shape: f32[1,128], index: 4, kind: input, shape index: {}]   ;;  %s2332_s5 = inlined_call_operand.vmem [shape: bf16[128,128], index: 5, kind: input, shape index: {}]   ;;  %s2333_s6 = inlined_call_operand.vmem [shape: bf16[128,128], index: 6, kind: input, shape index: {}]   ;;  %s2334_s7 = inlined_call_operand.vmem [shape: f32[1,128], index: 7, kind: input, shape index: {}]   ;;  %s2335_s8 = inlined_call_operand.vmem [shape: f32[1,128], index: 8, kind: input, shape index: {}]   ;;  %s2336_s9 = inlined_call_operand.vmem [shape: f32[256,128], index: 9, kind: output, shape index: {}]  }
   0x1 LB: > { %s1489_s10 = sadd.s32 4294967295, %s2046_s30   ;;  %p1493_p0 = scmp.ge.s32.totalorder %s2046_s30, 1  ;;  %s2046_s30 = sphi %s2098_s30, %s19_s30  }
   0x2   : > { %p288_p1 = scmp.lt.s32.totalorder %s2046_s30, 3 }
   0x4   : > { %p289_p2 = pnand %p1493_p0, %p288_p1 }
   0x5   : > { %v1744_v0 = vld [vmem:[%s2328_s1] sm:$0xff] (!%p289_p2)   ;;  %s1494_s13 = sshll.u32 (!%p289_p2), %s1489_s10, 4  ;;  %v1745_v1 = vld [vmem:[%s2328_s1 + $0x8] sm:$0xff] (!%p289_p2)   ;;  %v1746_v2 = vld [vmem:[%s2328_s1 + $0x10] sm:$0xff] (!%p289_p2)  }
   0x6   : > { %292 = sbr.rel (%p289_p2) target bundleno = 1053 (0x41d), region = 56  ;;  %p325_p3 = scmp.lt.s32.totalorder (!%p289_p2), %s1494_s13, 31  ;;  %1608 = vmatprep.subr.bf16.mxu0 (!%p289_p2), %v1744_v0  ;;  %v1747_v3 = vld [vmem:[%s2328_s1 + $0x18] sm:$0xff] (!%p289_p2)   ;;  %v1748_v5 = vld [vmem:[%s2328_s1 + $0x20] sm:$0xff] (!%p289_p2)   ;;  %v1749_v6 = vld [vmem:[%s2328_s1 + $0x28] sm:$0xff] (!%p289_p2)  }
   0x7   : > { %1609 = vmatpush3.bf16.msra.mxu0 (!%p289_p2), %v1744_v0  ;;  %v1750_v7 = vld [vmem:[%s2328_s1 + $0x30] sm:$0xff] (!%p289_p2)   ;;  %v1751_v8 = vld [vmem:[%s2328_s1 + $0x38] sm:$0xff] (!%p289_p2)   ;;  %v1760_v16 = vld [vmem:[%s2332_s5] sm:$0xff] (!%p289_p2)  }
   0x8   : > { %1610 = vmatprep.subr.bf16.mxu0 (!%p289_p2), %v1745_v1  ;;  %1640 = vmatprep.subr.bf16.mxu1 (!%p289_p2), %v1760_v16  ;;  %v1761_v17 = vld [vmem:[%s2332_s5 + $0x8] sm:$0xff] (!%p289_p2)   ;;  %v1762_v18 = vld [vmem:[%s2332_s5 + $0x10] sm:$0xff] (!%p289_p2)   ;;  %v1763_v19 = vld [vmem:[%s2332_s5 + $0x18] sm:$0xff] (!%p289_p2)  }
   0x9   : > { %1641 = vmatpush3.bf16.msra.mxu1 (!%p289_p2), %v1760_v16  ;;  %v1764_v20 = vld [vmem:[%s2332_s5 + $0x20] sm:$0xff] (!%p289_p2)   ;;  %v1765_v21 = vld [vmem:[%s2332_s5 + $0x28] sm:$0xff] (!%p289_p2)   ;;  %v1766_v22 = vld [vmem:[%s2332_s5 + $0x30] sm:$0xff] (!%p289_p2)  }
   0xa   : > { %1642 = vmatprep.subr.bf16.mxu1 (!%p289_p2), %v1761_v17  ;;  %v1767_v23 = vld [vmem:[%s2332_s5 + $0x38] sm:$0xff] (!%p289_p2)   ;;  %v2173_v24 = vld [vmem:[%s2330_s3] ss:$0 sm:$0xff] (!%p289_p2) }
   0xb   : > { %1611 = vmatpush3.bf16.msra.mxu0 (!%p289_p2), %v1745_v1 }
   0xc   : > { %1612 = vmatprep.subr.bf16.mxu0 (!%p289_p2), %v1746_v2 }
   0xd   : > { %s2338_s13 = smov (!%p325_p3, %s1494_s13), 31  ;;  %1643 = vmatpush3.bf16.msra.mxu1 %v1761_v17 }
   0xe   : > { %s1495_s18 = sshll.u32 %s2338_s13, 2  ;;  %1644 = vmatprep.subr.bf16.mxu1 %v1762_v18  ;;  %s1497_s11 = sshll.u32 %s2338_s13, 3 }
   0xf   : > { %s2121_s21 = scalar_lea.vmem %s2327_s0, %s1495_s18  ;;  %1613 = vmatpush3.bf16.msra.mxu0 %v1746_v2  ;;  %s2304_s13 = scalar_lea.vmem %s2336_s9, %s1497_s11 }
  0x10   : > { %v1752_v4 = vld [vmem:[%s2121_s21] sm:$0xff]   ;;  %1614 = vmatprep.subr.bf16.mxu0 %v1747_v3  ;;  %v1753_v9 = vld [vmem:[%s2121_s21 + $0x8] sm:$0xff]   ;;  %v1754_v10 = vld [vmem:[%s2121_s21 + $0x10] sm:$0xff]  }
  0x11   : > { %1624 = vmatprep.mubr.bf16.mxu0 %v1752_v4  ;;  %v1755_v11 = vld [vmem:[%s2121_s21 + $0x18] sm:$0xff]   ;;  %v1756_v12 = vld [vmem:[%s2121_s21 + $0x20] sm:$0xff]   ;;  %v1757_v13 = vld [vmem:[%s2121_s21 + $0x28] sm:$0xff]   ;;  %1645 = vmatpush3.bf16.msra.mxu1 %v1762_v18 }
  0x12   : > { %v1758_v14 = vld [vmem:[%s2121_s21 + $0x30] sm:$0xff]   ;;  %v1759_v15 = vld [vmem:[%s2121_s21 + $0x38] sm:$0xff]   ;;  %1646 = vmatprep.subr.bf16.mxu1 %v1763_v19 }
  0x13   : > { %1615 = vmatpush3.bf16.msra.mxu0 %v1747_v3 }
  0x14   : > { %1616 = vmatprep.subr.bf16.mxu0 %v1748_v5 }
  0x15   : > { %1647 = vmatpush3.bf16.msra.mxu1 %v1763_v19 }
  0x16   : > { %1648 = vmatprep.subr.bf16.mxu1 %v1764_v20 }
  0x17   : > { %1617 = vmatpush3.bf16.msra.mxu0 %v1748_v5 }
  0x18   : > { %1618 = vmatprep.subr.bf16.mxu0 %v1749_v6 }
  0x19   : > { %1649 = vmatpush3.bf16.msra.mxu1 %v1764_v20 }
  0x1a   : > { %1650 = vmatprep.subr.bf16.mxu1 %v1765_v21 }
  0x1b   : > { %1619 = vmatpush3.bf16.msra.mxu0 %v1749_v6 }
  0x1c   : > { %1620 = vmatprep.subr.bf16.mxu0 %v1750_v7 }
  0x1d   : > { %1651 = vmatpush3.bf16.msra.mxu1 %v1765_v21 }
  0x1e   : > { %1652 = vmatprep.subr.bf16.mxu1 %v1766_v22 }
  0x1f   : > { %1621 = vmatpush3.bf16.msra.mxu0 %v1750_v7 }
  0x20   : > { %1622 = vmatprep.subr.bf16.mxu0 %v1751_v8 }
  0x21   : > { %1653 = vmatpush3.bf16.msra.mxu1 %v1766_v22 }
  0x22   : > { %1654 = vmatprep.subr.bf16.mxu1 %v1767_v23 }
  0x23   : > { %1623 = vmatpush3.bf16.msra.mxu0 %v1751_v8 }
  0x25   : > { %1655 = vmatpush3.bf16.msra.mxu1 %v1767_v23 }
  0x26   : > { %1625 = vmatmul.mubr.bf16.vlgmr.msra.gmra.mrb[0].mxu0 %v1753_v9 }
  0x27   : > { %1628 = vmatprep.mubr.bf16.mxu0 %v1754_v10 }
  0x2e   : > { %1629 = vmatmul.mubr.bf16.gmra.mrb[4].mxu0 %v1755_v11 }
  0x2f   : > { %1632 = vmatprep.mubr.bf16.mxu0 %v1756_v12 }
  0x36   : > { %1633 = vmatmul.mubr.bf16.gmra.mrb[8].mxu0 %v1757_v13 }
  0x37   : > { %1636 = vmatprep.mubr.bf16.mxu0 %v1758_v14 }
  0x3e   : > { %1637 = vmatmul.mubr.bf16.gmra.mrb[12].mxu0 %v1759_v15 }
  0xf9   : > { %v1626_v25 = vpop.f32.mrb[0].mxu0 }
  0xfa   : > { %v515_v26 = vadd.f32 %v1626_v25, %v2173_v24  ;;  %v506_v27 = vpop.f32.mrb[1].mxu0 }
  0xfb   : > { %v507_v28 = vadd.f32 %v2173_v24, %v506_v27  ;;  %v1627_v29 = vpop.f32.mrb[2].mxu0 }
  0xfc   : > { %v571_v30 = vsub.f32 0.0, %v515_v26  ;;  %v518_v31 = vadd.f32 %v1627_v29, %v2173_v24  ;;  %v509_v32 = vpop.f32.mrb[3].mxu0 }
  0xfd   : > { %v569_v33 = vsub.f32 0.0, %v507_v28  ;;  %v510_v34 = vadd.f32 %v2173_v24, %v509_v32 }
  0xfe   : > { %v589_v35 = vmul.f32 1.442695, %v571_v30  ;;  %v572_v36 = vsub.f32 0.0, %v518_v31 }
  0xff   : > { %v585_v37 = vmul.f32 1.442695, %v569_v33  ;;  %v570_v38 = vsub.f32 0.0, %v510_v34 }
 0x100   : > { %1784 = vpow2.f32 %v589_v35  ;;  %v591_v39 = vmul.f32 1.442695, %v572_v36 }
 0x101   : > { %1786 = vpow2.f32 %v585_v37  ;;  %v587_v40 = vmul.f32 1.442695, %v570_v38  ;;  %v1630_v41 = vpop.f32.mrb[4].mxu0 }
 0x102   : > { %1788 = vpow2.f32 %v591_v39  ;;  %v531_v42 = vadd.f32 %v1630_v41, %v2173_v24  ;;  %v522_v43 = vpop.f32.mrb[5].mxu0 }
 0x103   : > { %1790 = vpow2.f32 %v587_v40  ;;  %v523_v44 = vadd.f32 %v2173_v24, %v522_v43  ;;  %v1631_v45 = vpop.f32.mrb[6].mxu0 }
 0x104   : > { %v575_v46 = vsub.f32 0.0, %v531_v42  ;;  %v534_v47 = vadd.f32 %v1631_v45, %v2173_v24  ;;  %v525_v48 = vpop.f32.mrb[7].mxu0 }
 0x105   : > { %v573_v49 = vsub.f32 0.0, %v523_v44  ;;  %v526_v50 = vadd.f32 %v2173_v24, %v525_v48 }
 0x106   : > { %v597_v51 = vmul.f32 1.442695, %v575_v46  ;;  %v576_v52 = vsub.f32 0.0, %v534_v47 }
 0x107   : > { %v593_v53 = vmul.f32 1.442695, %v573_v49  ;;  %v574_v54 = vsub.f32 0.0, %v526_v50 }
 0x108   : > { %1792 = vpow2.f32 %v597_v51  ;;  %v599_v55 = vmul.f32 1.442695, %v576_v52 }
 0x109   : > { %1794 = vpow2.f32 %v593_v53  ;;  %v595_v56 = vmul.f32 1.442695, %v574_v54  ;;  %v1634_v57 = vpop.f32.mrb[8].mxu0 }
 0x10a   : > { %v1785_v58 = vpop.eup %1784  ;;  %1796 = vpow2.f32 %v599_v55  ;;  %v547_v59 = vadd.f32 %v1634_v57, %v2173_v24  ;;  %v538_v60 = vpop.f32.mrb[9].mxu0 }
 0x10b   : > { %v1787_v61 = vpop.eup %1786  ;;  %v619_v62 = vadd.f32 1.0, %v1785_v58  ;;  %1798 = vpow2.f32 %v595_v56  ;;  %v539_v63 = vadd.f32 %v2173_v24, %v538_v60  ;;  %v1635_v0 = vpop.f32.mrb[10].mxu0 }
 0x10c   : > { %v1789_v1 = vpop.eup %1788  ;;  %v617_v2 = vadd.f32 1.0, %v1787_v61  ;;  %v579_v3 = vsub.f32 0.0, %v547_v59  ;;  %v550_v4 = vadd.f32 %v1635_v0, %v2173_v24  ;;  %v541_v5 = vpop.f32.mrb[11].mxu0 }
 0x10d   : > { %v1791_v6 = vpop.eup %1790  ;;  %1800 = vrcp.f32 %v619_v62  ;;  %v620_v7 = vadd.f32 1.0, %v1789_v1  ;;  %v577_v8 = vsub.f32 0.0, %v539_v63  ;;  %v542_v9 = vadd.f32 %v2173_v24, %v541_v5 }
 0x10e   : > { %1802 = vrcp.f32 %v617_v2  ;;  %v618_v10 = vadd.f32 1.0, %v1791_v6  ;;  %v605_v11 = vmul.f32 1.442695, %v579_v3  ;;  %v580_v12 = vsub.f32 0.0, %v550_v4 }
 0x10f   : > { %1804 = vrcp.f32 %v620_v7  ;;  %v601_v13 = vmul.f32 1.442695, %v577_v8  ;;  %v578_v14 = vsub.f32 0.0, %v542_v9 }
 0x110   : > { %1806 = vrcp.f32 %v618_v10  ;;  %v607_v15 = vmul.f32 1.442695, %v580_v12 }
 0x111   : > { %1808 = vpow2.f32 %v605_v11  ;;  %v603_v16 = vmul.f32 1.442695, %v578_v14  ;;  %v1638_v17 = vpop.f32.mrb[12].mxu0 }
 0x112   : > { %v1793_v18 = vpop.eup %1792  ;;  %1810 = vpow2.f32 %v601_v13  ;;  %v563_v19 = vadd.f32 %v1638_v17, %v2173_v24  ;;  %v554_v20 = vpop.f32.mrb[13].mxu0  ;;  %v1768_v17 = vld [vmem:[%s2333_s6] sm:$0xff]  }
 0x113   : > { %v1795_v21 = vpop.eup %1794  ;;  %v623_v22 = vadd.f32 1.0, %v1793_v18  ;;  %1812 = vpow2.f32 %v607_v15  ;;  %v555_v23 = vadd.f32 %v2173_v24, %v554_v20  ;;  %v1639_v25 = vpop.f32.mrb[14].mxu0  ;;  %1672 = vmatprep.subr.bf16.mxu0 %v1768_v17  ;;  %v1769_v18 = vld [vmem:[%s2333_s6 + $0x8] sm:$0xff]   ;;  %v1771_v20 = vld [vmem:[%s2333_s6 + $0x18] sm:$0xff]  }
 0x114   : > { %v1797_v26 = vpop.eup %1796  ;;  %v621_v27 = vadd.f32 1.0, %v1795_v21  ;;  %1814 = vpow2.f32 %v603_v16  ;;  %v583_v28 = vsub.f32 0.0, %v563_v19  ;;  %v566_v29 = vadd.f32 %v1639_v25, %v2173_v24  ;;  %v557_v30 = vpop.f32.mrb[15].mxu0  ;;  %1673 = vmatpush3.bf16.msra.mxu0 %v1768_v17  ;;  %v1770_v19 = vld [vmem:[%s2333_s6 + $0x10] sm:$0xff]   ;;  %v1772_v21 = vld [vmem:[%s2333_s6 + $0x20] sm:$0xff]   ;;  %v1775_v25 = vld [vmem:[%s2333_s6 + $0x38] sm:$0xff]  }
 0x115   : > { %v1799_v31 = vpop.eup %1798  ;;  %1816 = vrcp.f32 %v623_v22  ;;  %v624_v32 = vadd.f32 1.0, %v1797_v26  ;;  %v581_v33 = vsub.f32 0.0, %v555_v23  ;;  %v558_v34 = vadd.f32 %v2173_v24, %v557_v30  ;;  %1674 = vmatprep.subr.bf16.mxu0 %v1769_v18  ;;  %v1773_v22 = vld [vmem:[%s2333_s6 + $0x28] sm:$0xff]   ;;  %v1774_v23 = vld [vmem:[%s2333_s6 + $0x30] sm:$0xff]   ;;  %v2218_v26 = vld [vmem:[%s2334_s7] ss:$0 sm:$0xff] }
 0x116   : > { %1818 = vrcp.f32 %v621_v27  ;;  %v622_v35 = vadd.f32 1.0, %v1799_v31  ;;  %v613_v36 = vmul.f32 1.442695, %v583_v28  ;;  %v584_v37 = vsub.f32 0.0, %v566_v29 }
 0x117   : > { %v1801_v38 = vpop.eup %1800  ;;  %1820 = vrcp.f32 %v624_v32  ;;  %v609_v39 = vmul.f32 1.442695, %v581_v33  ;;  %v582_v40 = vsub.f32 0.0, %v558_v34 }
 0x118   : > { %v1803_v41 = vpop.eup %1802  ;;  %1822 = vrcp.f32 %v622_v35  ;;  %v615_v42 = vmul.f32 1.442695, %v584_v37  ;;  %1675 = vmatpush3.bf16.msra.mxu0 %v1769_v18 }
 0x119   : > { %v1805_v43 = vpop.eup %1804  ;;  %1824 = vpow2.f32 %v613_v36  ;;  %v611_v44 = vmul.f32 1.442695, %v582_v40  ;;  %1676 = vmatprep.subr.bf16.mxu0 %v1770_v19 }
 0x11a   : > { %v1807_v45 = vpop.eup %1806  ;;  %1826 = vpow2.f32 %v609_v39  ;;  %v650_v46 = vpack.c.bf16 %v1805_v43, %v1801_v38 }
 0x11b   : > { %v1809_v47 = vpop.eup %1808  ;;  %1828 = vpow2.f32 %v615_v42  ;;  %v649_v24 = vpack.c.bf16 %v1807_v45, %v1803_v41 }
 0x11c   : > { %v1811_v48 = vpop.eup %1810  ;;  %v627_v49 = vadd.f32 1.0, %v1809_v47  ;;  %1830 = vpow2.f32 %v611_v44  ;;  %1677 = vmatpush3.bf16.msra.mxu0 %v1770_v19 }
 0x11d   : > { %v1813_v50 = vpop.eup %1812  ;;  %v625_v51 = vadd.f32 1.0, %v1811_v48  ;;  %1656 = vmatprep.mubr.bf16.mxu1 %v649_v24  ;;  %1678 = vmatprep.subr.bf16.mxu0 %v1771_v20 }
 0x11e   : > { %v1815_v52 = vpop.eup %1814  ;;  %1832 = vrcp.f32 %v627_v49  ;;  %v628_v53 = vadd.f32 1.0, %v1813_v50  ;;  %1657 = vmatmul.mubr.bf16.vlgmr.msra.gmra.mrb[0].mxu1 %v650_v46 }
 0x11f   : > { %v1817_v54 = vpop.eup %1816  ;;  %1834 = vrcp.f32 %v625_v51  ;;  %v626_v55 = vadd.f32 1.0, %v1815_v52 }
 0x120   : > { %v1819_v56 = vpop.eup %1818  ;;  %1836 = vrcp.f32 %v628_v53  ;;  %1679 = vmatpush3.bf16.msra.mxu0 %v1771_v20 }
 0x121   : > { %v1821_v57 = vpop.eup %1820  ;;  %1838 = vrcp.f32 %v626_v55  ;;  %1680 = vmatprep.subr.bf16.mxu0 %v1772_v21 }
 0x122   : > { %v1823_v58 = vpop.eup %1822  ;;  %v652_v59 = vpack.c.bf16 %v1821_v57, %v1817_v54 }
 0x123   : > { %v1825_v60 = vpop.eup %1824  ;;  %v651_v61 = vpack.c.bf16 %v1823_v58, %v1819_v56 }
 0x124   : > { %v1827_v62 = vpop.eup %1826  ;;  %v631_v63 = vadd.f32 1.0, %v1825_v60  ;;  %1681 = vmatpush3.bf16.msra.mxu0 %v1772_v21 }
 0x125   : > { %v1829_v0 = vpop.eup %1828  ;;  %v629_v1 = vadd.f32 1.0, %v1827_v62  ;;  %1660 = vmatprep.mubr.bf16.mxu1 %v651_v61  ;;  %1682 = vmatprep.subr.bf16.mxu0 %v1773_v22 }
 0x126   : > { %v1831_v2 = vpop.eup %1830  ;;  %1840 = vrcp.f32 %v631_v63  ;;  %v632_v3 = vadd.f32 1.0, %v1829_v0  ;;  %1661 = vmatmul.mubr.bf16.gmra.mrb[4].mxu1 %v652_v59 }
 0x127   : > { %1842 = vrcp.f32 %v629_v1  ;;  %v630_v4 = vadd.f32 1.0, %v1831_v2 }
 0x128   : > { %v1833_v5 = vpop.eup %1832  ;;  %1844 = vrcp.f32 %v632_v3  ;;  %1683 = vmatpush3.bf16.msra.mxu0 %v1773_v22 }
 0x129   : > { %v1835_v6 = vpop.eup %1834  ;;  %1846 = vrcp.f32 %v630_v4  ;;  %1684 = vmatprep.subr.bf16.mxu0 %v1774_v23 }
 0x12a   : > { %v1837_v7 = vpop.eup %1836 }
 0x12b   : > { %v1839_v8 = vpop.eup %1838  ;;  %v654_v9 = vpack.c.bf16 %v1837_v7, %v1833_v5 }
 0x12c   : > { %v653_v10 = vpack.c.bf16 %v1839_v8, %v1835_v6  ;;  %1685 = vmatpush3.bf16.msra.mxu0 %v1774_v23 }
 0x12d   : > { %1686 = vmatprep.subr.bf16.mxu0 %v1775_v25 }
 0x12e   : > { %1664 = vmatprep.mubr.bf16.mxu1 %v653_v10 }
 0x12f   : > { %1665 = vmatmul.mubr.bf16.gmra.mrb[8].mxu1 %v654_v9 }
 0x130   : > { %v1841_v11 = vpop.eup %1840  ;;  %1687 = vmatpush3.bf16.msra.mxu0 %v1775_v25 }
 0x131   : > { %v1843_v12 = vpop.eup %1842 }
 0x132   : > { %v1845_v13 = vpop.eup %1844 }
 0x133   : > { %v1847_v14 = vpop.eup %1846  ;;  %v656_v15 = vpack.c.bf16 %v1845_v13, %v1841_v11 }
 0x134   : > { %v655_v16 = vpack.c.bf16 %v1847_v14, %v1843_v12 }
 0x136   : > { %1668 = vmatprep.mubr.bf16.mxu1 %v655_v16 }
 0x137   : > { %1669 = vmatmul.mubr.bf16.gmra.mrb[12].mxu1 %v656_v15 }
 0x1f1   : > { %v1658_v27 = vpop.f32.mrb[0].mxu1 }
 0x1f2   : > { %v771_v28 = vadd.f32 %v1658_v27, %v2218_v26  ;;  %v762_v29 = vpop.f32.mrb[1].mxu1 }
 0x1f3   : > { %v763_v30 = vadd.f32 %v2218_v26, %v762_v29  ;;  %v1659_v31 = vpop.f32.mrb[2].mxu1 }
 0x1f4   : > { %v827_v32 = vsub.f32 0.0, %v771_v28  ;;  %v774_v33 = vadd.f32 %v1659_v31, %v2218_v26  ;;  %v765_v34 = vpop.f32.mrb[3].mxu1 }
 0x1f5   : > { %v825_v35 = vsub.f32 0.0, %v763_v30  ;;  %v766_v36 = vadd.f32 %v2218_v26, %v765_v34 }
 0x1f6   : > { %v845_v37 = vmul.f32 1.442695, %v827_v32  ;;  %v828_v38 = vsub.f32 0.0, %v774_v33 }
 0x1f7   : > { %v841_v39 = vmul.f32 1.442695, %v825_v35  ;;  %v826_v40 = vsub.f32 0.0, %v766_v36 }
 0x1f8   : > { %1848 = vpow2.f32 %v845_v37  ;;  %v847_v41 = vmul.f32 1.442695, %v828_v38 }
 0x1f9   : > { %1850 = vpow2.f32 %v841_v39  ;;  %v843_v42 = vmul.f32 1.442695, %v826_v40  ;;  %v1662_v43 = vpop.f32.mrb[4].mxu1 }
 0x1fa   : > { %1852 = vpow2.f32 %v847_v41  ;;  %v787_v44 = vadd.f32 %v1662_v43, %v2218_v26  ;;  %v778_v45 = vpop.f32.mrb[5].mxu1 }
 0x1fb   : > { %1854 = vpow2.f32 %v843_v42  ;;  %v779_v46 = vadd.f32 %v2218_v26, %v778_v45  ;;  %v1663_v47 = vpop.f32.mrb[6].mxu1 }
 0x1fc   : > { %v831_v24 = vsub.f32 0.0, %v787_v44  ;;  %v790_v48 = vadd.f32 %v1663_v47, %v2218_v26  ;;  %v781_v49 = vpop.f32.mrb[7].mxu1 }
 0x1fd   : > { %v829_v50 = vsub.f32 0.0, %v779_v46  ;;  %v782_v51 = vadd.f32 %v2218_v26, %v781_v49 }
 0x1fe   : > { %v853_v52 = vmul.f32 1.442695, %v831_v24  ;;  %v832_v53 = vsub.f32 0.0, %v790_v48 }
 0x1ff   : > { %v849_v54 = vmul.f32 1.442695, %v829_v50  ;;  %v830_v55 = vsub.f32 0.0, %v782_v51 }
 0x200   : > { %1856 = vpow2.f32 %v853_v52  ;;  %v855_v56 = vmul.f32 1.442695, %v832_v53 }
 0x201   : > { %1858 = vpow2.f32 %v849_v54  ;;  %v851_v57 = vmul.f32 1.442695, %v830_v55 }
 0x202   : > { %v1849_v58 = vpop.eup %1848  ;;  %1860 = vpow2.f32 %v855_v56  ;;  %v1666_v59 = vpop.f32.mrb[8].mxu1 }
 0x203   : > { %v1851_v60 = vpop.eup %1850  ;;  %v875_v61 = vadd.f32 1.0, %v1849_v58  ;;  %1862 = vpow2.f32 %v851_v57  ;;  %v803_v62 = vadd.f32 %v1666_v59, %v2218_v26  ;;  %v794_v63 = vpop.f32.mrb[9].mxu1 }
 0x204   : > { %v1853_v0 = vpop.eup %1852  ;;  %v873_v1 = vadd.f32 1.0, %v1851_v60  ;;  %v795_v2 = vadd.f32 %v2218_v26, %v794_v63  ;;  %v1667_v3 = vpop.f32.mrb[10].mxu1 }
 0x205   : > { %v1855_v4 = vpop.eup %1854  ;;  %1864 = vrcp.f32 %v875_v61  ;;  %v876_v5 = vadd.f32 1.0, %v1853_v0  ;;  %v835_v6 = vsub.f32 0.0, %v803_v62  ;;  %v806_v7 = vadd.f32 %v1667_v3, %v2218_v26  ;;  %v797_v8 = vpop.f32.mrb[11].mxu1 }
 0x206   : > { %1866 = vrcp.f32 %v873_v1  ;;  %v874_v9 = vadd.f32 1.0, %v1855_v4  ;;  %v833_v10 = vsub.f32 0.0, %v795_v2  ;;  %v798_v11 = vadd.f32 %v2218_v26, %v797_v8 }
 0x207   : > { %1868 = vrcp.f32 %v876_v5  ;;  %v861_v12 = vmul.f32 1.442695, %v835_v6  ;;  %v836_v13 = vsub.f32 0.0, %v806_v7 }
 0x208   : > { %1870 = vrcp.f32 %v874_v9  ;;  %v857_v14 = vmul.f32 1.442695, %v833_v10  ;;  %v834_v15 = vsub.f32 0.0, %v798_v11 }
 0x209   : > { %1872 = vpow2.f32 %v861_v12  ;;  %v863_v16 = vmul.f32 1.442695, %v836_v13 }
 0x20a   : > { %v1857_v17 = vpop.eup %1856  ;;  %1874 = vpow2.f32 %v857_v14  ;;  %v859_v18 = vmul.f32 1.442695, %v834_v15  ;;  %v1670_v19 = vpop.f32.mrb[12].mxu1 }
 0x20b   : > { %v1859_v20 = vpop.eup %1858  ;;  %v879_v21 = vadd.f32 1.0, %v1857_v17  ;;  %1876 = vpow2.f32 %v863_v16  ;;  %v819_v22 = vadd.f32 %v1670_v19, %v2218_v26  ;;  %v810_v23 = vpop.f32.mrb[13].mxu1  ;;  %v1777_v19 = vld [vmem:[%s2329_s2 + $0x8] sm:$0xff]  }
 0x20c   : > { %v1861_v25 = vpop.eup %1860  ;;  %v877_v27 = vadd.f32 1.0, %v1859_v20  ;;  %1878 = vpow2.f32 %v859_v18  ;;  %v811_v28 = vadd.f32 %v2218_v26, %v810_v23  ;;  %v1671_v29 = vpop.f32.mrb[14].mxu1  ;;  %v1776_v18 = vld [vmem:[%s2329_s2] sm:$0xff]   ;;  %v1778_v20 = vld [vmem:[%s2329_s2 + $0x10] sm:$0xff]   ;;  %v1781_v23 = vld [vmem:[%s2329_s2 + $0x28] sm:$0xff]  }
 0x20d   : > { %v1863_v30 = vpop.eup %1862  ;;  %1880 = vrcp.f32 %v879_v21  ;;  %v880_v31 = vadd.f32 1.0, %v1861_v25  ;;  %v839_v32 = vsub.f32 0.0, %v819_v22  ;;  %v822_v33 = vadd.f32 %v1671_v29, %v2218_v26  ;;  %v813_v34 = vpop.f32.mrb[15].mxu1  ;;  %1704 = vmatprep.subr.bf16.mxu1 %v1776_v18  ;;  %v1779_v21 = vld [vmem:[%s2329_s2 + $0x18] sm:$0xff]   ;;  %v1780_v22 = vld [vmem:[%s2329_s2 + $0x20] sm:$0xff]   ;;  %v1782_v25 = vld [vmem:[%s2329_s2 + $0x30] sm:$0xff]  }
 0x20e   : > { %1882 = vrcp.f32 %v877_v27  ;;  %v878_v35 = vadd.f32 1.0, %v1863_v30  ;;  %v837_v36 = vsub.f32 0.0, %v811_v28  ;;  %v814_v37 = vadd.f32 %v2218_v26, %v813_v34  ;;  %1705 = vmatpush3.bf16.msra.mxu1 %v1776_v18  ;;  %v1783_v27 = vld [vmem:[%s2329_s2 + $0x38] sm:$0xff]   ;;  %v2263_v28 = vld [vmem:[%s2335_s8] ss:$0 sm:$0xff] }
 0x20f   : > { %v1865_v38 = vpop.eup %1864  ;;  %1884 = vrcp.f32 %v880_v31  ;;  %v869_v39 = vmul.f32 1.442695, %v839_v32  ;;  %v840_v40 = vsub.f32 0.0, %v822_v33  ;;  %1706 = vmatprep.subr.bf16.mxu1 %v1777_v19 }
 0x210   : > { %v1867_v41 = vpop.eup %1866  ;;  %1886 = vrcp.f32 %v878_v35  ;;  %v865_v42 = vmul.f32 1.442695, %v837_v36  ;;  %v838_v43 = vsub.f32 0.0, %v814_v37 }
 0x211   : > { %v1869_v44 = vpop.eup %1868  ;;  %1888 = vpow2.f32 %v869_v39  ;;  %v871_v45 = vmul.f32 1.442695, %v840_v40 }
 0x212   : > { %v1871_v46 = vpop.eup %1870  ;;  %1890 = vpow2.f32 %v865_v42  ;;  %v867_v47 = vmul.f32 1.442695, %v838_v43  ;;  %v906_v24 = vpack.c.bf16 %v1869_v44, %v1865_v38  ;;  %1707 = vmatpush3.bf16.msra.mxu1 %v1777_v19 }
 0x213   : > { %v1873_v48 = vpop.eup %1872  ;;  %1892 = vpow2.f32 %v871_v45  ;;  %v905_v49 = vpack.c.bf16 %v1871_v46, %v1867_v41  ;;  %1708 = vmatprep.subr.bf16.mxu1 %v1778_v20 }
 0x214   : > { %v1875_v50 = vpop.eup %1874  ;;  %v883_v26 = vadd.f32 1.0, %v1873_v48  ;;  %1894 = vpow2.f32 %v867_v47 }
 0x215   : > { %v1877_v51 = vpop.eup %1876  ;;  %v881_v52 = vadd.f32 1.0, %v1875_v50  ;;  %1688 = vmatprep.mubr.bf16.mxu0 %v905_v49 }
 0x216   : > { %v1879_v53 = vpop.eup %1878  ;;  %1896 = vrcp.f32 %v883_v26  ;;  %v884_v54 = vadd.f32 1.0, %v1877_v51  ;;  %1689 = vmatmul.mubr.bf16.vlgmr.msra.gmra.mrb[16].mxu0 %v906_v24  ;;  %1709 = vmatpush3.bf16.msra.mxu1 %v1778_v20 }
 0x217   : > { %v1881_v55 = vpop.eup %1880  ;;  %1898 = vrcp.f32 %v881_v52  ;;  %v882_v56 = vadd.f32 1.0, %v1879_v53  ;;  %1710 = vmatprep.subr.bf16.mxu1 %v1779_v21 }
 0x218   : > { %v1883_v57 = vpop.eup %1882  ;;  %1900 = vrcp.f32 %v884_v54 }
 0x219   : > { %v1885_v58 = vpop.eup %1884  ;;  %1902 = vrcp.f32 %v882_v56 }
 0x21a   : > { %v1887_v59 = vpop.eup %1886  ;;  %v908_v60 = vpack.c.bf16 %v1885_v58, %v1881_v55  ;;  %1711 = vmatpush3.bf16.msra.mxu1 %v1779_v21 }
 0x21b   : > { %v1889_v61 = vpop.eup %1888  ;;  %v907_v62 = vpack.c.bf16 %v1887_v59, %v1883_v57  ;;  %1712 = vmatprep.subr.bf16.mxu1 %v1780_v22 }
 0x21c   : > { %v1891_v63 = vpop.eup %1890  ;;  %v887_v0 = vadd.f32 1.0, %v1889_v61 }
 0x21d   : > { %v1893_v1 = vpop.eup %1892  ;;  %v885_v2 = vadd.f32 1.0, %v1891_v63  ;;  %1692 = vmatprep.mubr.bf16.mxu0 %v907_v62 }
 0x21e   : > { %v1895_v3 = vpop.eup %1894  ;;  %1904 = vrcp.f32 %v887_v0  ;;  %v888_v4 = vadd.f32 1.0, %v1893_v1  ;;  %1693 = vmatmul.mubr.bf16.gmra.mrb[20].mxu0 %v908_v60  ;;  %1713 = vmatpush3.bf16.msra.mxu1 %v1780_v22 }
 0x21f   : > { %1906 = vrcp.f32 %v885_v2  ;;  %v886_v5 = vadd.f32 1.0, %v1895_v3  ;;  %1714 = vmatprep.subr.bf16.mxu1 %v1781_v23 }
 0x220   : > { %v1897_v6 = vpop.eup %1896  ;;  %1908 = vrcp.f32 %v888_v4 }
 0x221   : > { %v1899_v7 = vpop.eup %1898  ;;  %1910 = vrcp.f32 %v886_v5 }
 0x222   : > { %v1901_v8 = vpop.eup %1900  ;;  %1715 = vmatpush3.bf16.msra.mxu1 %v1781_v23 }
 0x223   : > { %v1903_v9 = vpop.eup %1902  ;;  %v910_v10 = vpack.c.bf16 %v1901_v8, %v1897_v6  ;;  %1716 = vmatprep.subr.bf16.mxu1 %v1782_v25 }
 0x224   : > { %v909_v11 = vpack.c.bf16 %v1903_v9, %v1899_v7 }
 0x226   : > { %1696 = vmatprep.mubr.bf16.mxu0 %v909_v11  ;;  %1717 = vmatpush3.bf16.msra.mxu1 %v1782_v25 }
 0x227   : > { %1697 = vmatmul.mubr.bf16.gmra.mrb[24].mxu0 %v910_v10  ;;  %1718 = vmatprep.subr.bf16.mxu1 %v1783_v27 }
 0x228   : > { %v1905_v12 = vpop.eup %1904 }
 0x229   : > { %v1907_v13 = vpop.eup %1906 }
 0x22a   : > { %v1909_v14 = vpop.eup %1908  ;;  %1719 = vmatpush3.bf16.msra.mxu1 %v1783_v27 }
 0x22b   : > { %v1911_v15 = vpop.eup %1910  ;;  %v912_v16 = vpack.c.bf16 %v1909_v14, %v1905_v12 }
 0x22c   : > { %v911_v17 = vpack.c.bf16 %v1911_v15, %v1907_v13 }
 0x22e   : > { %1700 = vmatprep.mubr.bf16.mxu0 %v911_v17 }
 0x22f   : > { %1701 = vmatmul.mubr.bf16.gmra.mrb[28].mxu0 %v912_v16 }
 0x2e9   : > { %v1690_v29 = vpop.f32.mrb[16].mxu0 }
 0x2ea   : > { %v1027_v30 = vadd.f32 %v1690_v29, %v2263_v28  ;;  %v1018_v31 = vpop.f32.mrb[17].mxu0 }
 0x2eb   : > { %v1019_v32 = vadd.f32 %v2263_v28, %v1018_v31  ;;  %v1691_v33 = vpop.f32.mrb[18].mxu0 }
 0x2ec   : > { %v1083_v34 = vsub.f32 0.0, %v1027_v30  ;;  %v1030_v35 = vadd.f32 %v1691_v33, %v2263_v28  ;;  %v1021_v36 = vpop.f32.mrb[19].mxu0 }
 0x2ed   : > { %v1081_v37 = vsub.f32 0.0, %v1019_v32  ;;  %v1022_v38 = vadd.f32 %v2263_v28, %v1021_v36 }
 0x2ee   : > { %v1101_v39 = vmul.f32 1.442695, %v1083_v34  ;;  %v1084_v40 = vsub.f32 0.0, %v1030_v35 }
 0x2ef   : > { %v1097_v41 = vmul.f32 1.442695, %v1081_v37  ;;  %v1082_v42 = vsub.f32 0.0, %v1022_v38 }
 0x2f0   : > { %1912 = vpow2.f32 %v1101_v39  ;;  %v1103_v43 = vmul.f32 1.442695, %v1084_v40 }
 0x2f1   : > { %1914 = vpow2.f32 %v1097_v41  ;;  %v1099_v44 = vmul.f32 1.442695, %v1082_v42  ;;  %v1694_v45 = vpop.f32.mrb[20].mxu0 }
 0x2f2   : > { %1916 = vpow2.f32 %v1103_v43  ;;  %v1043_v46 = vadd.f32 %v1694_v45, %v2263_v28  ;;  %v1034_v47 = vpop.f32.mrb[21].mxu0 }
 0x2f3   : > { %1918 = vpow2.f32 %v1099_v44  ;;  %v1035_v24 = vadd.f32 %v2263_v28, %v1034_v47  ;;  %v1695_v48 = vpop.f32.mrb[22].mxu0 }
 0x2f4   : > { %v1087_v49 = vsub.f32 0.0, %v1043_v46  ;;  %v1046_v50 = vadd.f32 %v1695_v48, %v2263_v28  ;;  %v1037_v26 = vpop.f32.mrb[23].mxu0 }
 0x2f5   : > { %v1085_v51 = vsub.f32 0.0, %v1035_v24  ;;  %v1038_v52 = vadd.f32 %v2263_v28, %v1037_v26 }
 0x2f6   : > { %v1109_v53 = vmul.f32 1.442695, %v1087_v49  ;;  %v1088_v54 = vsub.f32 0.0, %v1046_v50 }
 0x2f7   : > { %v1105_v55 = vmul.f32 1.442695, %v1085_v51  ;;  %v1086_v56 = vsub.f32 0.0, %v1038_v52 }
 0x2f8   : > { %1920 = vpow2.f32 %v1109_v53  ;;  %v1111_v57 = vmul.f32 1.442695, %v1088_v54 }
 0x2f9   : > { %1922 = vpow2.f32 %v1105_v55  ;;  %v1107_v58 = vmul.f32 1.442695, %v1086_v56 }
 0x2fa   : > { %v1913_v59 = vpop.eup %1912  ;;  %1924 = vpow2.f32 %v1111_v57  ;;  %v1698_v60 = vpop.f32.mrb[24].mxu0 }
 0x2fb   : > { %v1915_v61 = vpop.eup %1914  ;;  %v1131_v62 = vadd.f32 1.0, %v1913_v59  ;;  %1926 = vpow2.f32 %v1107_v58  ;;  %v1059_v63 = vadd.f32 %v1698_v60, %v2263_v28  ;;  %v1050_v0 = vpop.f32.mrb[25].mxu0 }
 0x2fc   : > { %v1917_v1 = vpop.eup %1916  ;;  %v1129_v2 = vadd.f32 1.0, %v1915_v61  ;;  %v1051_v3 = vadd.f32 %v2263_v28, %v1050_v0  ;;  %v1699_v4 = vpop.f32.mrb[26].mxu0 }
 0x2fd   : > { %v1919_v5 = vpop.eup %1918  ;;  %1928 = vrcp.f32 %v1131_v62  ;;  %v1132_v6 = vadd.f32 1.0, %v1917_v1  ;;  %v1091_v7 = vsub.f32 0.0, %v1059_v63  ;;  %v1062_v8 = vadd.f32 %v1699_v4, %v2263_v28  ;;  %v1053_v9 = vpop.f32.mrb[27].mxu0 }
 0x2fe   : > { %1930 = vrcp.f32 %v1129_v2  ;;  %v1130_v10 = vadd.f32 1.0, %v1919_v5  ;;  %v1089_v11 = vsub.f32 0.0, %v1051_v3  ;;  %v1054_v12 = vadd.f32 %v2263_v28, %v1053_v9 }
 0x2ff   : > { %1932 = vrcp.f32 %v1132_v6  ;;  %v1117_v13 = vmul.f32 1.442695, %v1091_v7  ;;  %v1092_v14 = vsub.f32 0.0, %v1062_v8 }
 0x300   : > { %1934 = vrcp.f32 %v1130_v10  ;;  %v1113_v15 = vmul.f32 1.442695, %v1089_v11  ;;  %v1090_v16 = vsub.f32 0.0, %v1054_v12 }
 0x301   : > { %1936 = vpow2.f32 %v1117_v13  ;;  %v1119_v17 = vmul.f32 1.442695, %v1092_v14 }
 0x302   : > { %v1921_v18 = vpop.eup %1920  ;;  %1938 = vpow2.f32 %v1113_v15  ;;  %v1115_v19 = vmul.f32 1.442695, %v1090_v16  ;;  %v1702_v20 = vpop.f32.mrb[28].mxu0 }
 0x303   : > { %v1923_v21 = vpop.eup %1922  ;;  %v1135_v22 = vadd.f32 1.0, %v1921_v18  ;;  %1940 = vpow2.f32 %v1119_v17  ;;  %v1075_v23 = vadd.f32 %v1702_v20, %v2263_v28  ;;  %v1066_v25 = vpop.f32.mrb[29].mxu0 }
 0x304   : > { %v1925_v27 = vpop.eup %1924  ;;  %v1133_v29 = vadd.f32 1.0, %v1923_v21  ;;  %1942 = vpow2.f32 %v1115_v19  ;;  %v1067_v30 = vadd.f32 %v2263_v28, %v1066_v25  ;;  %v1703_v31 = vpop.f32.mrb[30].mxu0  ;;  %v2284_v19 = vld [vmem:[%s2331_s4] ss:$0 sm:$0xff] }
 0x305   : > { %v1927_v32 = vpop.eup %1926  ;;  %1944 = vrcp.f32 %v1135_v22  ;;  %v1136_v33 = vadd.f32 1.0, %v1925_v27  ;;  %v1095_v34 = vsub.f32 0.0, %v1075_v23  ;;  %v1078_v35 = vadd.f32 %v1703_v31, %v2263_v28  ;;  %v1069_v36 = vpop.f32.mrb[31].mxu0 }
 0x306   : > { %1946 = vrcp.f32 %v1133_v29  ;;  %v1134_v37 = vadd.f32 1.0, %v1927_v32  ;;  %v1093_v38 = vsub.f32 0.0, %v1067_v30  ;;  %v1070_v39 = vadd.f32 %v2263_v28, %v1069_v36 }
 0x307   : > { %v1929_v40 = vpop.eup %1928  ;;  %1948 = vrcp.f32 %v1136_v33  ;;  %v1125_v41 = vmul.f32 1.442695, %v1095_v34  ;;  %v1096_v42 = vsub.f32 0.0, %v1078_v35 }
 0x308   : > { %v1931_v43 = vpop.eup %1930  ;;  %1950 = vrcp.f32 %v1134_v37  ;;  %v1121_v44 = vmul.f32 1.442695, %v1093_v38  ;;  %v1094_v45 = vsub.f32 0.0, %v1070_v39 }
 0x309   : > { %v1933_v46 = vpop.eup %1932  ;;  %1952 = vpow2.f32 %v1125_v41  ;;  %v1127_v47 = vmul.f32 1.442695, %v1096_v42 }
 0x30a   : > { %v1935_v24 = vpop.eup %1934  ;;  %1954 = vpow2.f32 %v1121_v44  ;;  %v1123_v48 = vmul.f32 1.442695, %v1094_v45  ;;  %v1162_v49 = vpack.c.bf16 %v1933_v46, %v1929_v40 }
 0x30b   : > { %v1937_v50 = vpop.eup %1936  ;;  %1956 = vpow2.f32 %v1127_v47  ;;  %v1161_v26 = vpack.c.bf16 %v1935_v24, %v1931_v43 }
 0x30c   : > { %v1939_v51 = vpop.eup %1938  ;;  %v1139_v28 = vadd.f32 1.0, %v1937_v50  ;;  %1958 = vpow2.f32 %v1123_v48 }
 0x30d   : > { %v1941_v52 = vpop.eup %1940  ;;  %v1137_v53 = vadd.f32 1.0, %v1939_v51  ;;  %1720 = vmatprep.mubr.bf16.mxu1 %v1161_v26 }
 0x30e   : > { %v1943_v54 = vpop.eup %1942  ;;  %1960 = vrcp.f32 %v1139_v28  ;;  %v1140_v55 = vadd.f32 1.0, %v1941_v52  ;;  %1721 = vmatmul.mubr.bf16.vlgmr.msra.gmra.mrb[16].mxu1 %v1162_v49 }
 0x30f   : > { %v1945_v56 = vpop.eup %1944  ;;  %1962 = vrcp.f32 %v1137_v53  ;;  %v1138_v57 = vadd.f32 1.0, %v1943_v54 }
 0x310   : > { %v1947_v58 = vpop.eup %1946  ;;  %1964 = vrcp.f32 %v1140_v55 }
 0x311   : > { %v1949_v59 = vpop.eup %1948  ;;  %1966 = vrcp.f32 %v1138_v57 }
 0x312   : > { %v1951_v60 = vpop.eup %1950  ;;  %v1164_v61 = vpack.c.bf16 %v1949_v59, %v1945_v56 }
 0x313   : > { %v1953_v62 = vpop.eup %1952  ;;  %v1163_v63 = vpack.c.bf16 %v1951_v60, %v1947_v58 }
 0x314   : > { %v1955_v0 = vpop.eup %1954  ;;  %v1143_v1 = vadd.f32 1.0, %v1953_v62 }
 0x315   : > { %v1957_v2 = vpop.eup %1956  ;;  %v1141_v3 = vadd.f32 1.0, %v1955_v0  ;;  %1724 = vmatprep.mubr.bf16.mxu1 %v1163_v63 }
 0x316   : > { %v1959_v4 = vpop.eup %1958  ;;  %1968 = vrcp.f32 %v1143_v1  ;;  %v1144_v5 = vadd.f32 1.0, %v1957_v2  ;;  %1725 = vmatmul.mubr.bf16.gmra.mrb[20].mxu1 %v1164_v61 }
 0x317   : > { %1970 = vrcp.f32 %v1141_v3  ;;  %v1142_v6 = vadd.f32 1.0, %v1959_v4 }
 0x318   : > { %v1961_v7 = vpop.eup %1960  ;;  %1972 = vrcp.f32 %v1144_v5 }
 0x319   : > { %v1963_v8 = vpop.eup %1962  ;;  %1974 = vrcp.f32 %v1142_v6 }
 0x31a   : > { %v1965_v9 = vpop.eup %1964 }
 0x31b   : > { %v1967_v10 = vpop.eup %1966  ;;  %v1166_v11 = vpack.c.bf16 %v1965_v9, %v1961_v7 }
 0x31c   : > { %v1165_v12 = vpack.c.bf16 %v1967_v10, %v1963_v8 }
 0x31e   : > { %1728 = vmatprep.mubr.bf16.mxu1 %v1165_v12 }
 0x31f   : > { %1729 = vmatmul.mubr.bf16.gmra.mrb[24].mxu1 %v1166_v11 }
 0x320   : > { %v1969_v13 = vpop.eup %1968 }
 0x321   : > { %v1971_v14 = vpop.eup %1970 }
 0x322   : > { %v1973_v15 = vpop.eup %1972 }
 0x323   : > { %v1975_v16 = vpop.eup %1974  ;;  %v1168_v17 = vpack.c.bf16 %v1973_v15, %v1969_v13 }
 0x324   : > { %v1167_v18 = vpack.c.bf16 %v1975_v16, %v1971_v14 }
 0x326   : > { %1732 = vmatprep.mubr.bf16.mxu1 %v1167_v18 }
 0x327   : > { %1733 = vmatmul.mubr.bf16.gmra.mrb[28].mxu1 %v1168_v17 }
 0x3e1   : > { %v1722_v20 = vpop.f32.mrb[16].mxu1 }
 0x3e2   : > { %v1283_v21 = vadd.f32 %v1722_v20, %v2284_v19  ;;  %v1274_v22 = vpop.f32.mrb[17].mxu1 }
 0x3e3   : > { %v1275_v23 = vadd.f32 %v2284_v19, %v1274_v22  ;;  %v1723_v25 = vpop.f32.mrb[18].mxu1 }
 0x3e4   : > { %v1339_v27 = vsub.f32 0.0, %v1283_v21  ;;  %v1286_v29 = vadd.f32 %v1723_v25, %v2284_v19  ;;  %v1277_v30 = vpop.f32.mrb[19].mxu1 }
 0x3e5   : > { %v1337_v31 = vsub.f32 0.0, %v1275_v23  ;;  %v1278_v32 = vadd.f32 %v2284_v19, %v1277_v30 }
 0x3e6   : > { %v1357_v33 = vmul.f32 1.442695, %v1339_v27  ;;  %v1340_v34 = vsub.f32 0.0, %v1286_v29 }
 0x3e7   : > { %v1353_v35 = vmul.f32 1.442695, %v1337_v31  ;;  %v1338_v36 = vsub.f32 0.0, %v1278_v32 }
 0x3e8   : > { %1976 = vpow2.f32 %v1357_v33  ;;  %v1359_v37 = vmul.f32 1.442695, %v1340_v34 }
 0x3e9   : > { %1978 = vpow2.f32 %v1353_v35  ;;  %v1355_v38 = vmul.f32 1.442695, %v1338_v36  ;;  %v1726_v39 = vpop.f32.mrb[20].mxu1 }
 0x3ea   : > { %1980 = vpow2.f32 %v1359_v37  ;;  %v1299_v40 = vadd.f32 %v1726_v39, %v2284_v19  ;;  %v1290_v41 = vpop.f32.mrb[21].mxu1 }
 0x3eb   : > { %1982 = vpow2.f32 %v1355_v38  ;;  %v1291_v42 = vadd.f32 %v2284_v19, %v1290_v41  ;;  %v1727_v43 = vpop.f32.mrb[22].mxu1 }
 0x3ec   : > { %v1343_v44 = vsub.f32 0.0, %v1299_v40  ;;  %v1302_v45 = vadd.f32 %v1727_v43, %v2284_v19  ;;  %v1293_v46 = vpop.f32.mrb[23].mxu1 }
 0x3ed   : > { %v1341_v47 = vsub.f32 0.0, %v1291_v42  ;;  %v1294_v24 = vadd.f32 %v2284_v19, %v1293_v46 }
 0x3ee   : > { %v1365_v48 = vmul.f32 1.442695, %v1343_v44  ;;  %v1344_v49 = vsub.f32 0.0, %v1302_v45 }
 0x3ef   : > { %v1361_v50 = vmul.f32 1.442695, %v1341_v47  ;;  %v1342_v26 = vsub.f32 0.0, %v1294_v24 }
 0x3f0   : > { %1984 = vpow2.f32 %v1365_v48  ;;  %v1367_v51 = vmul.f32 1.442695, %v1344_v49 }
 0x3f1   : > { %1986 = vpow2.f32 %v1361_v50  ;;  %v1363_v28 = vmul.f32 1.442695, %v1342_v26 }
 0x3f2   : > { %v1977_v52 = vpop.eup %1976  ;;  %1988 = vpow2.f32 %v1367_v51  ;;  %v1730_v53 = vpop.f32.mrb[24].mxu1 }
 0x3f3   : > { %v1979_v54 = vpop.eup %1978  ;;  %v1387_v55 = vadd.f32 1.0, %v1977_v52  ;;  %1990 = vpow2.f32 %v1363_v28  ;;  %v1315_v56 = vadd.f32 %v1730_v53, %v2284_v19  ;;  %v1306_v57 = vpop.f32.mrb[25].mxu1 }
 0x3f4   : > { %v1981_v58 = vpop.eup %1980  ;;  %v1385_v59 = vadd.f32 1.0, %v1979_v54  ;;  %v1307_v60 = vadd.f32 %v2284_v19, %v1306_v57  ;;  %v1731_v61 = vpop.f32.mrb[26].mxu1 }
 0x3f5   : > { %v1983_v62 = vpop.eup %1982  ;;  %1992 = vrcp.f32 %v1387_v55  ;;  %v1388_v63 = vadd.f32 1.0, %v1981_v58  ;;  %v1347_v0 = vsub.f32 0.0, %v1315_v56  ;;  %v1318_v1 = vadd.f32 %v1731_v61, %v2284_v19  ;;  %v1309_v2 = vpop.f32.mrb[27].mxu1 }
 0x3f6   : > { %1994 = vrcp.f32 %v1385_v59  ;;  %v1386_v3 = vadd.f32 1.0, %v1983_v62  ;;  %v1345_v4 = vsub.f32 0.0, %v1307_v60  ;;  %v1310_v5 = vadd.f32 %v2284_v19, %v1309_v2 }
 0x3f7   : > { %1996 = vrcp.f32 %v1388_v63  ;;  %v1373_v6 = vmul.f32 1.442695, %v1347_v0  ;;  %v1348_v7 = vsub.f32 0.0, %v1318_v1 }
 0x3f8   : > { %1998 = vrcp.f32 %v1386_v3  ;;  %v1369_v8 = vmul.f32 1.442695, %v1345_v4  ;;  %v1346_v9 = vsub.f32 0.0, %v1310_v5 }
 0x3f9   : > { %2000 = vpow2.f32 %v1373_v6  ;;  %v1375_v10 = vmul.f32 1.442695, %v1348_v7 }
 0x3fa   : > { %v1985_v11 = vpop.eup %1984  ;;  %2002 = vpow2.f32 %v1369_v8  ;;  %v1371_v12 = vmul.f32 1.442695, %v1346_v9  ;;  %v1734_v13 = vpop.f32.mrb[28].mxu1 }
 0x3fb   : > { %v1987_v14 = vpop.eup %1986  ;;  %v1391_v15 = vadd.f32 1.0, %v1985_v11  ;;  %2004 = vpow2.f32 %v1375_v10  ;;  %v1331_v16 = vadd.f32 %v1734_v13, %v2284_v19  ;;  %v1322_v17 = vpop.f32.mrb[29].mxu1 }
 0x3fc   : > { %v1989_v18 = vpop.eup %1988  ;;  %v1389_v20 = vadd.f32 1.0, %v1987_v14  ;;  %2006 = vpow2.f32 %v1371_v12  ;;  %v1323_v21 = vadd.f32 %v2284_v19, %v1322_v17  ;;  %v1735_v22 = vpop.f32.mrb[30].mxu1 }
 0x3fd   : > { %v1991_v23 = vpop.eup %1990  ;;  %2008 = vrcp.f32 %v1391_v15  ;;  %v1392_v25 = vadd.f32 1.0, %v1989_v18  ;;  %v1351_v27 = vsub.f32 0.0, %v1331_v16  ;;  %v1334_v29 = vadd.f32 %v1735_v22, %v2284_v19  ;;  %v1325_v30 = vpop.f32.mrb[31].mxu1 }
 0x3fe   : > { %2010 = vrcp.f32 %v1389_v20  ;;  %v1390_v31 = vadd.f32 1.0, %v1991_v23  ;;  %v1349_v32 = vsub.f32 0.0, %v1323_v21  ;;  %v1326_v33 = vadd.f32 %v2284_v19, %v1325_v30 }
 0x3ff   : > { %v1993_v34 = vpop.eup %1992  ;;  %2012 = vrcp.f32 %v1392_v25  ;;  %v1381_v35 = vmul.f32 1.442695, %v1351_v27  ;;  %v1352_v36 = vsub.f32 0.0, %v1334_v29 }
 0x400   : > { %v1995_v37 = vpop.eup %1994  ;;  %1419 = vst [vmem:[%s2304_s13 + $0x10] sm:$0xff] %v1993_v34  ;;  %2014 = vrcp.f32 %v1390_v31  ;;  %v1377_v38 = vmul.f32 1.442695, %v1349_v32  ;;  %v1350_v39 = vsub.f32 0.0, %v1326_v33 }
 0x401   : > { %v1997_v40 = vpop.eup %1996  ;;  %1417 = vst [vmem:[%s2304_s13] sm:$0xff] %v1995_v37  ;;  %2016 = vpow2.f32 %v1381_v35  ;;  %v1383_v41 = vmul.f32 1.442695, %v1352_v36 }
 0x402   : > { %v1999_v42 = vpop.eup %1998  ;;  %1420 = vst [vmem:[%s2304_s13 + $0x18] sm:$0xff] %v1997_v40  ;;  %2018 = vpow2.f32 %v1377_v38  ;;  %v1379_v43 = vmul.f32 1.442695, %v1350_v39 }
 0x403   : > { %v2001_v19 = vpop.eup %2000  ;;  %1418 = vst [vmem:[%s2304_s13 + $0x8] sm:$0xff] %v1999_v42  ;;  %2020 = vpow2.f32 %v1383_v41 }
 0x404   : > { %v2003_v44 = vpop.eup %2002  ;;  %v1395_v45 = vadd.f32 1.0, %v2001_v19  ;;  %2022 = vpow2.f32 %v1379_v43 }
 0x405   : > { %v2005_v46 = vpop.eup %2004  ;;  %v1393_v47 = vadd.f32 1.0, %v2003_v44 }
 0x406   : > { %v2007_v24 = vpop.eup %2006  ;;  %2024 = vrcp.f32 %v1395_v45  ;;  %v1396_v48 = vadd.f32 1.0, %v2005_v46 }
 0x407   : > { %v2009_v49 = vpop.eup %2008  ;;  %2026 = vrcp.f32 %v1393_v47  ;;  %v1394_v50 = vadd.f32 1.0, %v2007_v24 }
 0x408   : > { %v2011_v26 = vpop.eup %2010  ;;  %1423 = vst [vmem:[%s2304_s13 + $0x30] sm:$0xff] %v2009_v49  ;;  %2028 = vrcp.f32 %v1396_v48 }
 0x409   : > { %v2013_v51 = vpop.eup %2012  ;;  %1421 = vst [vmem:[%s2304_s13 + $0x20] sm:$0xff] %v2011_v26  ;;  %2030 = vrcp.f32 %v1394_v50 }
 0x40a   : > { %v2015_v28 = vpop.eup %2014  ;;  %1424 = vst [vmem:[%s2304_s13 + $0x38] sm:$0xff] %v2013_v51 }
 0x40b   : > { %v2017_v52 = vpop.eup %2016  ;;  %1422 = vst [vmem:[%s2304_s13 + $0x28] sm:$0xff] %v2015_v28 }
 0x40c   : > { %v2019_v53 = vpop.eup %2018  ;;  %v1399_v54 = vadd.f32 1.0, %v2017_v52 }
 0x40d   : > { %v2021_v55 = vpop.eup %2020  ;;  %v1397_v56 = vadd.f32 1.0, %v2019_v53 }
 0x40e   : > { %v2023_v57 = vpop.eup %2022  ;;  %2032 = vrcp.f32 %v1399_v54  ;;  %v1400_v58 = vadd.f32 1.0, %v2021_v55 }
 0x40f   : > { %2034 = vrcp.f32 %v1397_v56  ;;  %v1398_v59 = vadd.f32 1.0, %v2023_v57 }
 0x410   : > { %v2025_v60 = vpop.eup %2024  ;;  %2036 = vrcp.f32 %v1400_v58 }
 0x411   : > { %v2027_v61 = vpop.eup %2026  ;;  %1427 = vst [vmem:[%s2304_s13 + $0x50] sm:$0xff] %v2025_v60  ;;  %2038 = vrcp.f32 %v1398_v59 }
 0x412   : > { %v2029_v62 = vpop.eup %2028  ;;  %1425 = vst [vmem:[%s2304_s13 + $0x40] sm:$0xff] %v2027_v61 }
 0x413   : > { %v2031_v63 = vpop.eup %2030  ;;  %1428 = vst [vmem:[%s2304_s13 + $0x58] sm:$0xff] %v2029_v62 }
 0x414   : > { %1426 = vst [vmem:[%s2304_s13 + $0x48] sm:$0xff] %v2031_v63 }
 0x418   : > { %v2033_v0 = vpop.eup %2032 }
 0x419   : > { %v2035_v1 = vpop.eup %2034  ;;  %1431 = vst [vmem:[%s2304_s13 + $0x70] sm:$0xff] %v2033_v0 }
 0x41a   : > { %v2037_v2 = vpop.eup %2036  ;;  %1429 = vst [vmem:[%s2304_s13 + $0x60] sm:$0xff] %v2035_v1 }
 0x41b   : > { %v2039_v3 = vpop.eup %2038  ;;  %1432 = vst [vmem:[%s2304_s13 + $0x78] sm:$0xff] %v2037_v2 }
 0x41c   : > { %1430 = vst [vmem:[%s2304_s13 + $0x68] sm:$0xff] %v2039_v3 }
 0x41d PF: > { %s19_s30 = sadd.s32 1, %s2046_s30  }
 0x41e   : > { %p16_p4 = scmp.ge.s32.totalorder %s19_s30, 4  }
 0x420   :  { %18 = sbr.rel (!%p16_p4) target bundleno = 1 (0x1), region = 86 }

</bundles_post_ra>
